<compile_context>
chip_gen: v7x
topology: tpu7x:2x2x1
jax: 0.10.0
libtpu: 0.0.40
codegen_flags: <defaults>
</compile_context>

<pallas_src>
import numpy as np
import jax
import jax.numpy as jnp
from jax import lax
from jax.experimental import pallas as pl
from jax.experimental.pallas import tpu as pltpu


# ---------------------------------------------------------------------------
# Kernels
# ---------------------------------------------------------------------------

def _online_lse_step(logits, tgt, j, tv, nv, m_sc, l_sc, t_sc, nll_ref):
    """One vocab-tile step of the online log-sum-exp + target-logit gather."""

    @pl.when(j == 0)
    def _():
        m_sc[...] = jnp.full_like(m_sc, -jnp.inf)
        l_sc[...] = jnp.zeros_like(l_sc)
        t_sc[...] = jnp.zeros_like(t_sc)

    # online log-sum-exp across vocab tiles (f32 VPU/EUP math)
    m_prev = m_sc[...]
    m_new = jnp.maximum(m_prev, jnp.max(logits, axis=-1, keepdims=True))
    alpha = jnp.exp(m_prev - m_new)
    l_sc[...] = alpha * l_sc[...] + jnp.sum(jnp.exp(logits - m_new),
                                            axis=-1, keepdims=True)
    m_sc[...] = m_new

    # target-logit gather restricted to the columns owned by this vocab tile.
    # tile-local iota compared against the shifted (tn,1) target -> cheaper VPU work.
    col_local = lax.broadcasted_iota(jnp.int32, logits.shape, 1)
    tmask = col_local == (tgt - j * tv)
    t_sc[...] += jnp.sum(jnp.where(tmask, logits, 0.0), axis=-1, keepdims=True)

    @pl.when(j == nv - 1)
    def _():
        nll_ref[...] = m_sc[...] + jnp.log(l_sc[...]) - t_sc[...]


def _lmhead_ce_kernel(h_ref, w_ref, tgt_ref, logits_ref, nll_ref,
                      m_sc, l_sc, t_sc):
    # h_ref:      (tn, H)   bf16
    # w_ref:      (H,  tv)  bf16   (vocab tile j)
    # tgt_ref:    (tn, 1)   int32  (next-token ids; dummy 0 for last position)
    # logits_ref: (tn, tv)  bf16
    # nll_ref:    (tn, 1)   f32    (resident across the vocab axis)
    j = pl.program_id(1)
    nv = pl.num_programs(1)
    tv = logits_ref.shape[-1]

    # MXU matmul with f32 accumulation; write back bf16 logits (lane-dense, tv>=128)
    logits = jnp.dot(h_ref[...], w_ref[...], preferred_element_type=jnp.float32)
    logits_ref[...] = logits.astype(logits_ref.dtype)

    _online_lse_step(logits, tgt_ref[...], j, tv, nv, m_sc, l_sc, t_sc, nll_ref)


def _lmhead_nll_kernel(h_ref, w_ref, tgt_ref, nll_ref, m_sc, l_sc, t_sc):
    # nll-only variant: no (tn, tv) logits materialization / HBM write.
    j = pl.program_id(1)
    nv = pl.num_programs(1)
    tv = w_ref.shape[-1]

    logits = jnp.dot(h_ref[...], w_ref[...], preferred_element_type=jnp.float32)
    _online_lse_step(logits, tgt_ref[...], j, tv, nv, m_sc, l_sc, t_sc, nll_ref)


# ---------------------------------------------------------------------------
# Tile / VMEM budgeting
# ---------------------------------------------------------------------------

def _round_up(x, m):
    return ((x + m - 1) // m) * m


def _device_kind():
    try:
        return jax.devices()[0].device_kind.lower()
    except Exception:
        return ""


def _vmem_capacity_bytes():
    try:
        cap = int(getattr(pltpu.get_tpu_info(), "vmem_capacity_bytes", 0) or 0)
        if cap > 0:
            return cap
    except Exception:
        pass
    kind = _device_kind()
    if "v7" in kind:
        return 64 * 2 ** 20
    return 128 * 2 ** 20


def _tile_bytes(tn, tv, H, with_logits):
    bf16 = 2
    # double-buffered pipeline tiles: hidden rows, weight column tile, (optional) logits
    need = 2 * (tn * H * bf16 + H * tv * bf16)
    if with_logits:
        need += 2 * tn * tv * bf16
    need += 2 * (tn * 4 + tn * 4)     # targets + nll blocks (i32 / f32)
    need += 3 * tn * 4                # online-LSE scratch
    return need


def _select_tiles(N, V, H, tn_req, tv_req, with_logits):
    kind = _device_kind()
    cap = _vmem_capacity_bytes()
    budget = int(0.80 * cap)

    # Generation-aware defaults: big enough row tiles to push the weight re-stream
    # past the HBM roofline (v5e ~245, v6e ~650, v7x ~310 FLOPs/byte thresholds).
    if "v5" in kind:
        tn_d, tv_d = 256, 1024
    elif "v7" in kind:
        tn_d, tv_d = 512, 512
    else:  # v6e and unknown/default
        tn_d, tv_d = 512, 1024

    tn = tn_req if tn_req is not None else tn_d
    tv = tv_req if tv_req is not None else tv_d

    # vocab tile must divide V (or fall back to full extent, always legal)
    if V % tv != 0:
        for cand in (2048, 1024, 512, 256, 128):
            if cand <= tv and V % cand == 0:
                tv = cand
                break
        else:
            tv = V

    # row tile: multiple of 8, no larger than the padded row count
    tn = min(tn, _round_up(N, 8))
    tn = max(8, (tn // 8) * 8)

    # v7x megacore: keep at least 2 row programs so the 'parallel' axis splits 2 TCs
    if "v7" in kind and tn_req is None:
        while N // max(tn, 1) < 2 and tn > 128:
            tn //= 2

    # shrink tiles (tv first, then tn) until the double-buffered working set fits VMEM
    if tv_req is None:
        while (_tile_bytes(tn, tv, H, with_logits) > budget
               and tv >= 512 and V % (tv // 2) == 0):
            tv //= 2
    if tn_req is None:
        while _tile_bytes(tn, tv, H, with_logits) > budget and tn > 256:
            tn //= 2

    return tn, tv, cap


def _vmem_limit_bytes(tn, tv, H, cap, with_logits):
    need = _tile_bytes(tn, tv, H, with_logits)
    limit = min(max(2 * need, 32 * 2 ** 20), int(0.85 * cap))
    limit = max(limit, min(need + (4 * 2 ** 20), cap))   # never below the working set
    return int(limit)


# ---------------------------------------------------------------------------
# Host wrapper
# ---------------------------------------------------------------------------

def lmhead_token_nll(hidden, w_vocab, targets, *, tn=None, tv=None,
                     return_logits=True):
    """hidden: (N, H), w_vocab: (H, V), targets: (N, 1) int32.
    Returns (logits (N, V) bf16 or None, nll (N, 1) f32)."""
    N, H = hidden.shape
    Hw, V = w_vocab.shape
    assert Hw == H

    tn, tv, cap = _select_tiles(N, V, H, tn, tv, return_logits)

    # pad ragged N up to a multiple of tn (padded rows sliced off by the caller)
    N_pad = _round_up(N, tn)
    if N_pad != N:
        hidden = jnp.pad(hidden, ((0, N_pad - N), (0, 0)))
        targets = jnp.pad(targets, ((0, N_pad - N), (0, 0)))
    n_row, n_voc = N_pad // tn, V // tv

    hidden = hidden.astype(jnp.bfloat16)
    w_vocab = w_vocab.astype(jnp.bfloat16)
    targets = targets.astype(jnp.int32)

    bytes_accessed = (N_pad * H * 2 + n_row * H * V * 2   # hidden + streamed weights
                      + N_pad * 4 + N_pad * 4)            # targets + nll
    if return_logits:
        bytes_accessed += N_pad * V * 2                   # bf16 logits write
    cost = pl.CostEstimate(
        flops=2 * N_pad * H * V,
        transcendentals=N_pad * V,                        # exp in the online LSE
        bytes_accessed=bytes_accessed,
    )

    in_specs = [
        pl.BlockSpec((tn, H), lambda i, j: (i, 0)),       # hidden rows
        pl.BlockSpec((H, tv), lambda i, j: (0, j)),       # streamed weight tiles
        pl.BlockSpec((tn, 1), lambda i, j: (i, 0)),       # next-token targets
    ]
    nll_spec = pl.BlockSpec((tn, 1), lambda i, j: (i, 0)) # f32 nll (resident over j)

    compiler_params = pltpu.CompilerParams(
        dimension_semantics=("parallel", "arbitrary"),    # token axis -> megacore split
        vmem_limit_bytes=_vmem_limit_bytes(tn, tv, H, cap, return_logits),
    )
    scratch = [pltpu.VMEM((tn, 1), jnp.float32)] * 3

    if return_logits:
        grid_spec = pltpu.PrefetchScalarGridSpec(
            num_scalar_prefetch=0,
            grid=(n_row, n_voc),                          # vocab (reduction) axis last
            in_specs=in_specs,
            out_specs=[pl.BlockSpec((tn, tv), lambda i, j: (i, j)), nll_spec],
            scratch_shapes=scratch,
        )
        logits_p, nll_p = pl.pallas_call(
            _lmhead_ce_kernel,
            out_shape=(
                jax.ShapeDtypeStruct((N_pad, V), jnp.bfloat16),
                jax.ShapeDtypeStruct((N_pad, 1), jnp.float32),
            ),
            grid_spec=grid_spec,
            compiler_params=compiler_params,
            cost_estimate=cost,
        )(hidden, w_vocab, targets)
        return logits_p[:N], nll_p[:N]

    grid_spec = pltpu.PrefetchScalarGridSpec(
        num_scalar_prefetch=0,
        grid=(n_row, n_voc),
        in_specs=in_specs,
        out_specs=nll_spec,
        scratch_shapes=scratch,
    )
    nll_p = pl.pallas_call(
        _lmhead_nll_kernel,
        out_shape=jax.ShapeDtypeStruct((N_pad, 1), jnp.float32),
        grid_spec=grid_spec,
        compiler_params=compiler_params,
        cost_estimate=cost,
    )(hidden, w_vocab, targets)
    return None, nll_p[:N]


def forward_features(input_ids, attention_mask, emb_table, w_vocab, *, tn=None, tv=None):
    """Mirrors Model_Base.forward_features with a synthetic embedding 'model'."""
    B, L = input_ids.shape
    V, H = emb_table.shape

    # synthetic model body (glue): embedding lookup -> hidden states
    hidden = emb_table[input_ids].reshape(B * L, H)

    # shifted targets: target[b, t] = input_ids[b, t+1]; dummy 0 at the last position
    targets = jnp.concatenate(
        [input_ids[:, 1:], jnp.zeros((B, 1), dtype=jnp.int32)], axis=1
    ).reshape(B * L, 1)

    logits_flat, nll_flat = lmhead_token_nll(hidden, w_vocab, targets, tn=tn, tv=tv,
                                             return_logits=True)

    logits = logits_flat.reshape(B, L, V)
    token_nll = nll_flat.reshape(B, L)[:, :-1]     # (B, L-1) == F.cross_entropy(..., 'none')

    # per-example variable-length lists (host-side python, like the torch list-comp);
    # single host transfer of the full nll / mask arrays, then numpy slicing.
    mask_np = np.asarray(attention_mask)
    nll_np = np.asarray(token_nll)
    token_nll_list = [nll_np[b, : int(mask_np[b].sum()) - 1] for b in range(B)]

    # TODO(synk): tokenizer/generate paths of Model_Base are host-side HF string code
    # with no tensor compute; not translated.
    return {"logits": logits, "token_nll": token_nll, "token_nll_list": token_nll_list}


# ---------------------------------------------------------------------------
# Demo / correctness check
# ---------------------------------------------------------------------------

if __name__ == "__main__":
    B, L, H, V = 2, 128, 128, 1024
    key = jax.random.PRNGKey(0)
    k_ids, k_emb, k_w = jax.random.split(key, 3)

    input_ids = jax.random.randint(k_ids, (B, L), 0, V, dtype=jnp.int32)
    attention_mask = jnp.concatenate(
        [jnp.ones((1, L), dtype=jnp.int32),
         jnp.concatenate([jnp.ones((1, L - 16), dtype=jnp.int32),
                          jnp.zeros((1, 16), dtype=jnp.int32)], axis=1)],
        axis=0)

    # deterministic synthetic parameters
    emb_table = jax.random.normal(k_emb, (V, H), dtype=jnp.float32) * 0.05
    w_vocab = jax.random.normal(k_w, (H, V), dtype=jnp.float32) * 0.05

    # explicit tn/tv so the small demo exercises multiple row AND vocab tiles
    # (production calls use the per-chip defaults from _select_tiles()).
    out = forward_features(input_ids, attention_mask, emb_table, w_vocab, tn=128, tv=256)
    jax.block_until_ready(out["logits"])
    jax.block_until_ready(out["token_nll"])

    # pure-JAX reference of the cross-entropy path (same bf16 inputs / f32 accumulation)
    hidden_ref = emb_table[input_ids].reshape(B * L, H).astype(jnp.bfloat16)
    logits_ref = jnp.dot(hidden_ref, w_vocab.astype(jnp.bfloat16),
                         preferred_element_type=jnp.float32).reshape(B, L, V)
    logp = jax.nn.log_softmax(logits_ref, axis=-1)
    nll_ref_full = -jnp.take_along_axis(
        logp, jnp.concatenate([input_ids[:, 1:],
                               jnp.zeros((B, 1), jnp.int32)], axis=1)[..., None],
        axis=-1)[..., 0]
    nll_ref = nll_ref_full[:, :-1]

    np.testing.assert_allclose(np.asarray(out["token_nll"]), np.asarray(nll_ref),
                               rtol=1e-3, atol=1e-3)
    np.testing.assert_allclose(np.asarray(out["logits"], dtype=np.float32),
                               np.asarray(logits_ref.astype(jnp.bfloat16),
                                          dtype=np.float32),
                               rtol=2e-2, atol=2e-2)

    # (2) nll-only variant with chip-default tiles (no logits materialization)
    targets_flat = jnp.concatenate(
        [input_ids[:, 1:], jnp.zeros((B, 1), dtype=jnp.int32)], axis=1
    ).reshape(B * L, 1)
    hidden_flat = emb_table[input_ids].reshape(B * L, H)
    _, nll_only = lmhead_token_nll(hidden_flat, w_vocab, targets_flat,
                                   return_logits=False)
    jax.block_until_ready(nll_only)
    np.testing.assert_allclose(np.asarray(nll_only.reshape(B, L)[:, :-1]),
                               np.asarray(nll_ref), rtol=1e-3, atol=1e-3)

    # (3) ragged row count (N not a multiple of tn) to exercise the padding path
    N_rag = 200
    _, nll_rag = lmhead_token_nll(hidden_flat[:N_rag], w_vocab, targets_flat[:N_rag],
                                  tn=128, tv=256, return_logits=True)
    jax.block_until_ready(nll_rag)
    np.testing.assert_allclose(np.asarray(nll_rag[:, 0]),
                               np.asarray(nll_ref_full.reshape(-1)[:N_rag]),
                               rtol=1e-3, atol=1e-3)

    print("KERNEL_OK")
</pallas_src>

<mosaic_0001>
module attributes {stable_mosaic.version = 11 : i64} {
  func.func @_lmhead_ce_kernel(%arg0: i32, %arg1: i32, %arg2: memref<128x128xbf16, #tpu.memory_space<vmem>>, %arg3: memref<128x256xbf16, #tpu.memory_space<vmem>>, %arg4: memref<128x1xi32, #tpu.memory_space<vmem>>, %arg5: memref<128x256xbf16, #tpu.memory_space<vmem>>, %arg6: memref<128x1xf32, #tpu.memory_space<vmem>>, %arg7: memref<128x1xf32, #tpu.memory_space<vmem>>, %arg8: memref<128x1xf32, #tpu.memory_space<vmem>>, %arg9: memref<128x1xf32, #tpu.memory_space<vmem>>) attributes {dimension_semantics = [#tpu.dimension_semantics<parallel>, #tpu.dimension_semantics<arbitrary>], iteration_bounds = array<i64: 2, 4>, scalar_prefetch = 0 : i64, scratch_operands = 3 : i64, tpu.core_type = #tpu.core_type<tc>, window_params = [{transform_indices = @transform_0, window_bounds = array<i64: 128, 128>}, {transform_indices = @transform_1, window_bounds = array<i64: 128, 256>}, {transform_indices = @transform_2, window_bounds = array<i64: 128, 1>}, {transform_indices = @transform_3, window_bounds = array<i64: 128, 256>}, {transform_indices = @transform_4, window_bounds = array<i64: 128, 1>}]} {
    %c0 = arith.constant 0 : index
    %c0_0 = arith.constant 0 : index
    %0 = vector.load %arg2[%c0, %c0_0] : memref<128x128xbf16, #tpu.memory_space<vmem>>, vector<128x128xbf16>
    %c0_1 = arith.constant 0 : index
    %c0_2 = arith.constant 0 : index
    %1 = vector.load %arg3[%c0_1, %c0_2] : memref<128x256xbf16, #tpu.memory_space<vmem>>, vector<128x256xbf16>
    %cst = arith.constant dense<0.000000e+00> : vector<128x256xf32>
    %2 = tpu.matmul %0, %1, %cst {dimension_numbers = #tpu.dot_dimension_numbers<[1], [0], [0], [1], [0, 0, 1, 1], [], []>} : vector<128x128xbf16>, vector<128x256xbf16>, vector<128x256xf32> -> vector<128x256xf32>
    %3 = arith.truncf %2 : vector<128x256xf32> to vector<128x256xbf16>
    %c0_3 = arith.constant 0 : index
    %c0_4 = arith.constant 0 : index
    %4 = vector.load %arg5[%c0_3, %c0_4] : memref<128x256xbf16, #tpu.memory_space<vmem>>, vector<128x256xbf16>
    tpu.vector_store %arg5[%c0_3, %c0_4], %3 {strides = array<i32>} : memref<128x256xbf16, #tpu.memory_space<vmem>>, vector<128x256xbf16>,
    %c0_5 = arith.constant 0 : index
    %c0_6 = arith.constant 0 : index
    %5 = vector.load %arg4[%c0_5, %c0_6] : memref<128x1xi32, #tpu.memory_space<vmem>>, vector<128x1xi32>
    %c0_i32 = arith.constant 0 : i32
    %6 = arith.cmpi eq, %arg1, %c0_i32 : i32
    %7 = arith.extui %6 : i1 to i32
    %c0_i32_7 = arith.constant 0 : i32
    %8 = arith.cmpi ne, %7, %c0_i32_7 : i32
    scf.if %8 {
      %cst_25 = arith.constant 0xFF800000 : f32
      %41 = vector.broadcast %cst_25 : f32 to vector<128x1xf32>
      %c0_26 = arith.constant 0 : index
      %c0_27 = arith.constant 0 : index
      %42 = vector.load %arg7[%c0_26, %c0_27] : memref<128x1xf32, #tpu.memory_space<vmem>>, vector<128x1xf32>
      tpu.vector_store %arg7[%c0_26, %c0_27], %41 {strides = array<i32>} : memref<128x1xf32, #tpu.memory_space<vmem>>, vector<128x1xf32>,
      %cst_28 = arith.constant 0.000000e+00 : f32
      %43 = vector.broadcast %cst_28 : f32 to vector<128x1xf32>
      %c0_29 = arith.constant 0 : index
      %c0_30 = arith.constant 0 : index
      %44 = vector.load %arg8[%c0_29, %c0_30] : memref<128x1xf32, #tpu.memory_space<vmem>>, vector<128x1xf32>
      tpu.vector_store %arg8[%c0_29, %c0_30], %43 {strides = array<i32>} : memref<128x1xf32, #tpu.memory_space<vmem>>, vector<128x1xf32>,
      %cst_31 = arith.constant 0.000000e+00 : f32
      %45 = vector.broadcast %cst_31 : f32 to vector<128x1xf32>
      %c0_32 = arith.constant 0 : index
      %c0_33 = arith.constant 0 : index
      %46 = vector.load %arg9[%c0_32, %c0_33] : memref<128x1xf32, #tpu.memory_space<vmem>>, vector<128x1xf32>
      tpu.vector_store %arg9[%c0_32, %c0_33], %45 {strides = array<i32>} : memref<128x1xf32, #tpu.memory_space<vmem>>, vector<128x1xf32>,
    } else {
    }
    %c0_8 = arith.constant 0 : index
    %c0_9 = arith.constant 0 : index
    %9 = vector.load %arg7[%c0_8, %c0_9] : memref<128x1xf32, #tpu.memory_space<vmem>>, vector<128x1xf32>
    %cst_10 = arith.constant dense<0xFF800000> : vector<128xf32>
    %10 = vector.multi_reduction <maximumf>, %2, %cst_10 [1] : vector<128x256xf32> to vector<128xf32>
    %11 = vector.shape_cast %10 : vector<128xf32> to vector<128x1xf32>
    %12 = arith.maximumf %9, %11 : vector<128x1xf32>
    %13 = arith.subf %9, %12 : vector<128x1xf32>
    %14 = math.exp %13 : vector<128x1xf32>
    %c0_11 = arith.constant 0 : index
    %c0_12 = arith.constant 0 : index
    %15 = vector.load %arg8[%c0_11, %c0_12] : memref<128x1xf32, #tpu.memory_space<vmem>>, vector<128x1xf32>
    %16 = arith.mulf %14, %15 : vector<128x1xf32>
    %17 = vector.broadcast %12 : vector<128x1xf32> to vector<128x256xf32>
    %18 = arith.subf %2, %17 : vector<128x256xf32>
    %19 = math.exp %18 : vector<128x256xf32>
    %cst_13 = arith.constant dense<0.000000e+00> : vector<128xf32>
    %20 = vector.multi_reduction <add>, %19, %cst_13 [1] : vector<128x256xf32> to vector<128xf32>
    %21 = vector.shape_cast %20 : vector<128xf32> to vector<128x1xf32>
    %22 = arith.addf %16, %21 : vector<128x1xf32>
    %c0_14 = arith.constant 0 : index
    %c0_15 = arith.constant 0 : index
    %23 = vector.load %arg8[%c0_14, %c0_15] : memref<128x1xf32, #tpu.memory_space<vmem>>, vector<128x1xf32>
    tpu.vector_store %arg8[%c0_14, %c0_15], %22 {strides = array<i32>} : memref<128x1xf32, #tpu.memory_space<vmem>>, vector<128x1xf32>,
    %c0_16 = arith.constant 0 : index
    %c0_17 = arith.constant 0 : index
    %24 = vector.load %arg7[%c0_16, %c0_17] : memref<128x1xf32, #tpu.memory_space<vmem>>, vector<128x1xf32>
    tpu.vector_store %arg7[%c0_16, %c0_17], %12 {strides = array<i32>} : memref<128x1xf32, #tpu.memory_space<vmem>>, vector<128x1xf32>,
    %25 = tpu.iota {dimensions = array<i32: 1>} : vector<128x256xi32>
    %c256_i32 = arith.constant 256 : i32
    %26 = arith.muli %arg1, %c256_i32 : i32
    %27 = vector.broadcast %26 : i32 to vector<128x1xi32>
    %28 = arith.subi %5, %27 : vector<128x1xi32>
    %29 = vector.broadcast %28 : vector<128x1xi32> to vector<128x256xi32>
    %30 = arith.cmpi eq, %25, %29 : vector<128x256xi32>
    %c0_18 = arith.constant 0 : index
    %c0_19 = arith.constant 0 : index
    %31 = vector.load %arg9[%c0_18, %c0_19] : memref<128x1xf32, #tpu.memory_space<vmem>>, vector<128x1xf32>
    %cst_20 = arith.constant 0.000000e+00 : f32
    %32 = vector.broadcast %cst_20 : f32 to vector<128x256xf32>
    %33 = arith.select %30, %2, %32 : vector<128x256xi1>, vector<128x256xf32>
    %cst_21 = arith.constant dense<0.000000e+00> : vector<128xf32>
    %34 = vector.multi_reduction <add>, %33, %cst_21 [1] : vector<128x256xf32> to vector<128xf32>
    %35 = vector.shape_cast %34 : vector<128xf32> to vector<128x1xf32>
    %36 = arith.addf %31, %35 : vector<128x1xf32>
    %c0_22 = arith.constant 0 : index
    %c0_23 = arith.constant 0 : index
    %37 = vector.load %arg9[%c0_22, %c0_23] : memref<128x1xf32, #tpu.memory_space<vmem>>, vector<128x1xf32>
    tpu.vector_store %arg9[%c0_22, %c0_23], %36 {strides = array<i32>} : memref<128x1xf32, #tpu.memory_space<vmem>>, vector<128x1xf32>,
    %c3_i32 = arith.constant 3 : i32
    %38 = arith.cmpi eq, %arg1, %c3_i32 : i32
    %39 = arith.extui %38 : i1 to i32
    %c0_i32_24 = arith.constant 0 : i32
    %40 = arith.cmpi ne, %39, %c0_i32_24 : i32
    scf.if %40 {
      %c0_25 = arith.constant 0 : index
      %c0_26 = arith.constant 0 : index
      %41 = vector.load %arg7[%c0_25, %c0_26] : memref<128x1xf32, #tpu.memory_space<vmem>>, vector<128x1xf32>
      %c0_27 = arith.constant 0 : index
      %c0_28 = arith.constant 0 : index
      %42 = vector.load %arg8[%c0_27, %c0_28] : memref<128x1xf32, #tpu.memory_space<vmem>>, vector<128x1xf32>
      %43 = math.log %42 : vector<128x1xf32>
      %44 = arith.addf %41, %43 : vector<128x1xf32>
      %c0_29 = arith.constant 0 : index
      %c0_30 = arith.constant 0 : index
      %45 = vector.load %arg9[%c0_29, %c0_30] : memref<128x1xf32, #tpu.memory_space<vmem>>, vector<128x1xf32>
      %46 = arith.subf %44, %45 : vector<128x1xf32>
      %c0_31 = arith.constant 0 : index
      %c0_32 = arith.constant 0 : index
      %47 = vector.load %arg6[%c0_31, %c0_32] : memref<128x1xf32, #tpu.memory_space<vmem>>, vector<128x1xf32>
      tpu.vector_store %arg6[%c0_31, %c0_32], %46 {strides = array<i32>} : memref<128x1xf32, #tpu.memory_space<vmem>>, vector<128x1xf32>,
    } else {
    }
    return
  }
  func.func @transform_0(%arg0: i32, %arg1: i32) -> (i32, i32) {
    %c0_i32 = arith.constant 0 : i32
    %c0_i32_0 = arith.constant 0 : i32
    return %arg0, %c0_i32 : i32, i32
  }
  func.func @transform_1(%arg0: i32, %arg1: i32) -> (i32, i32) {
    %c0_i32 = arith.constant 0 : i32
    %c0_i32_0 = arith.constant 0 : i32
    return %c0_i32, %arg1 : i32, i32
  }
  func.func @transform_2(%arg0: i32, %arg1: i32) -> (i32, i32) {
    %c0_i32 = arith.constant 0 : i32
    %c0_i32_0 = arith.constant 0 : i32
    return %arg0, %c0_i32 : i32, i32
  }
  func.func @transform_3(%arg0: i32, %arg1: i32) -> (i32, i32) {
    %c0_i32 = arith.constant 0 : i32
    return %arg0, %arg1 : i32, i32
  }
  func.func @transform_4(%arg0: i32, %arg1: i32) -> (i32, i32) {
    %c0_i32 = arith.constant 0 : i32
    %c0_i32_0 = arith.constant 0 : i32
    return %arg0, %c0_i32 : i32, i32
  }
}

</mosaic_0001>

<bundles_post_ra>
// kernel: tpu_custom_call.1
= control target key start
LH: loop header
LB: loop body
LE: loop exit
PB: predicated region body
PF: predicated region fallthrough
CT: control target
= control target key end

     0   :  { %10 = vsyncpa [#allocation6], 0  ;;  %s3217_s0 = inlined_call_operand.vmem [shape: bf16[256,128], index: 0, kind: input, shape index: {}]   ;;  %s3218_s1 = inlined_call_operand.hbm [shape: bf16[128,1024], index: 1, kind: input, shape index: {}]   ;;  %s3219_s2 = inlined_call_operand.vmem [shape: s32[256,1], index: 2, kind: input, shape index: {}]   ;;  %s3220_s3 = inlined_call_operand.hbm [shape: bf16[256,1024], index: 3, kind: output, shape index: {0}]   ;;  %s3221_s4 = inlined_call_operand.vmem [shape: f32[256,1], index: 4, kind: output, shape index: {1}]  }
   0x1   :  { %12 = vsyncpa [#allocation6 + $0x1], 0 }
   0x2   :  { %13 = vsyncpa [#allocation7], 0 }
   0x3   :  { %15 = vsyncpa [#allocation7 + $0x1], 0  ;;  %s2265_s15 = smov 0   ;;  %s2267_s16 = smov 0  }
   0x4   :  { %s2269_s17 = smov 0   ;;  %s2271_s18 = smov 0  }
   0x5   :  { %s2273_s19 = smov 0   ;;  %s2275_s20 = smov 0  }
   0x6   :  { %s2277_s21 = smov 0   ;;  %s2279_s22 = smov 0  }
   0x7   :  { %s2281_s23 = smov 0   ;;  %s2283_s24 = smov 0  }
   0x8   :  { %s2285_s25 = smov 0  }
   0x9 LB: > { %s1702_s26 = sadd.s32 4294967295, %s2227_s25   ;;  %s1703_s27 = sadd.s32 4294967294, %s2227_s25   ;;  %s2227_s25 = sphi %s2285_s25, %s21_s25   ;;  %s2223_s24 = sphi %s2283_s24, %s3332_s24   ;;  %s2219_s23 = sphi %s2281_s23, %s3331_s23   ;;  %s2215_s22 = sphi %s2279_s22, %s3330_s22   ;;  %s2211_s21 = sphi %s2277_s21, %s3329_s21   ;;  %s2207_s20 = sphi %s2275_s20, %s3328_s20   ;;  %s2203_s19 = sphi %s2273_s19, %s3327_s19   ;;  %s2199_s18 = sphi %s2271_s18, %s3326_s18   ;;  %s2195_s17 = sphi %s2269_s17, %s3325_s17   ;;  %s2191_s16 = sphi %s2267_s16, %s3324_s16   ;;  %s2187_s15 = sphi %s2265_s15, %s3323_s15  }
   0xa   : > { %s30_s28 = sadd.s32 1, %s2219_s23  ;;  %s33_s29 = sadd.s32 1, %s2223_s24 }
   0xb   : > { %p31_p0 = scmp.ge.s32.totalorder %s30_s28, 4  ;;  %s66_s30 = sadd.s32 1, %s2207_s20 }
   0xc   : > { %p73_p1 = scmp.ne.s32.totalorder %s2207_s20, %s2203_s19  ;;  %p74_p2 = scmp.eq.s32.totalorder %s2227_s25, 0 }
   0xd   : > { %s3334_s28 = smov (%p31_p0, %s30_s28), 0  ;;  %s3336_s29 = smov (!%p31_p0, %s33_s29), %s2223_s24 }
   0xe   : > { %3249 = sst [smem:[#allocation11_spill]] %s3334_s28  ;;  %s63_s5 = ssub.s32 %s2219_s23, %s3334_s28 }
   0xf   : > { %p2331_p3 = por %p74_p2, %p73_p1  ;;  %p35_p4 = scmp.ge.s32.totalorder %s3336_s29, 2 }
  0x10   : > { %p64_p5 = scmp.eq.s32.totalorder %s63_s5, 0  ;;  %p79_p6 = scmp.ne.s32.totalorder %s2203_s19, %s2199_s18 }
  0x11   : > { %p80_p7 = scmp.eq.s32.totalorder %s1702_s26, 0  ;;  %s3338_s29 = smov (%p35_p4, %s3336_s29), 0 }
  0x12   : > { %3251 = sst [smem:[#allocation12_spill]] %s3338_s29  ;;  %s115_s9 = ssub.s32 %s2223_s24, %s3338_s29 }
  0x13   : > { %s2339_s7 = scalar_select %p64_p5, %s2207_s20, %s66_s30  }
  0x14   : > { %p2341_p8 = por %p80_p7, %p79_p6  ;;  %s117_s10 = sor.u32 %s115_s9, %s63_s5 }
  0x15   : > { %s120_s11 = sadd.s32 1, %s2195_s17  ;;  %p118_p9 = scmp.eq.s32.totalorder %s117_s10, 0 }
  0x16   : > { %p130_p10 = scmp.ne.s32.totalorder %s2195_s17, %s2191_s16  ;;  %p131_p11 = scmp.eq.s32.totalorder %s1702_s26, 7 }
  0x17   : > { %p136_p12 = scmp.ne.s32.totalorder %s2191_s16, %s2187_s15  ;;  %p137_p0 = scmp.eq.s32.totalorder %s1703_s27, 7 }
  0x18   : > { %s2353_s12 = scalar_select %p118_p9, %s2195_s17, %s120_s11  }
  0x19   : > { %p2355_p13 = por %p131_p11, %p130_p10  ;;  %p1814_p1 = scmp.lt.s32.totalorder %s2227_s25, 8 }
  0x1a   : > { %p2360_p2 = por %p137_p0, %p136_p12  ;;  %s192_s18 = sand.u32 1, %s2207_s20  }
  0x1b   : > { %s3253_s13 = scalar_select %p2355_p13, 1, 0 }
  0x1c   : > { %s3254_s14 = scalar_select %p2360_p2, 1, 0 }
  0x1d   : > { %s1706_s30 = sshll.u32 %s192_s18, 7  ;;  %s1768_s5 = sshll.u32 %s2219_s23, 7 }
  0x1e   : > { %s2369_s26 = scalar_lea.hbm %s3218_s1, %s1768_s5  ;;  %s196_s11 = scalar_lea.vmem [#allocation5], %s1706_s30 }
  0x1f   : > { %s203_s29 = sshll.u32 %s196_s11, 4  ;;  %p2375_p4 = pnand %p1814_p1, %p2331_p3  ;;  %s2371_s29 = int_to_ptr.vmem [resolvable:$true] %s203_s29 }
  0x20   : > { %s2379_s28 = scalar_lea.sflag [#allocation6], %s192_s18  ;;  %s2075_s9 = scalar_lea.hbm %s2369_s26, 2048 }
  0x21   : > { %p2076_p5 = scmp.ne.s32.totalorder %s2369_s26, %s2075_s9  ;;  %p2077_p6 = pneg %p2375_p4 }
  0x22   : > { %s2080_s6 = scalar_lea.hbm %s3218_s1, 8192  ;;  %p2081_p3 = scmp.lt.u32.totalorder %s2369_s26, %s3218_s1 }
  0x23   : > { %p2078_p7 = pnand %p2077_p6, %p2076_p5  ;;  %p2082_p10 = scmp.lt.u32.totalorder %s2080_s6, %s2075_s9 }
  0x24   : > { %p2084_p12 = scmp.lt.u32.totalorder %s2075_s9, %s2369_s26 }
  0x25   : > { %p2079_p9 = pneg %p2078_p7  ;;  %p2083_p11 = por %p2082_p10, %p2081_p3 }
  0x27   : > { %p2085_p0 = por %p2084_p12, %p2083_p11 }
  0x29   : > { %p2086_p1 = pnand %p2085_p0, %p2079_p9 }
  0x2b   : > { %2089 = shalt.err (!%p2086_p1)
}
  0x2c   : > { %s2090_s18 = scalar_lea.vmem %s2371_s29, 2048  ;;  %s2229_s30 = smov [#allocation5]  }
  0x2d   : > { %p2091_p5 = scmp.ne.s32.totalorder %s2371_s29, %s2090_s18  ;;  %s2095_s5 = sshll.u32 %s2229_s30, 4  ;;  %s2096_s5 = int_to_ptr.vmem [resolvable:$false] %s2095_s5 }
  0x2e   : > { %s2097_s10 = scalar_lea.vmem %s2096_s5, 4096  ;;  %p2098_p13 = scmp.lt.s32.totalorder %s2371_s29, %s2096_s5 }
  0x2f   : > { %p2093_p7 = pnand %p2091_p5, %p2077_p6  ;;  %p2099_p3 = scmp.lt.s32.totalorder %s2097_s10, %s2090_s18 }
  0x31   : > { %p2094_p2 = pneg %p2093_p7  ;;  %p2100_p10 = por %p2099_p3, %p2098_p13 }
  0x33   : > { %p2101_p11 = pnand %p2100_p10, %p2094_p2 }
  0x35   : > { %2104 = shalt.err (!%p2101_p11)
}
  0x36   : > { %s2230_s9 = smov 512   ;;  %s2231_s6 = smov 128  }
  0x37   : > { %s2232_s11 = smov 8   ;;  %p1709_p6 = scmp.ge.s32.totalorder %s2227_s25, 1 }
  0x38   : > { %1809 = dma.hbm_to_vmem [thread:$0]  (!%p2375_p4), %s2369_s26, 2048, %s2371_s29, %s2379_s28, %s2230_s9, %s2231_s6, %s2232_s11  }
  0x39   : > { %p220_p9 = scmp.lt.s32.totalorder %s2227_s25, 9 }
  0x3b   : > { %p221_p12 = pnand %p1709_p6, %p220_p9 }
  0x3d   : > { %224 = sbr.rel (%p221_p12) target bundleno = 964 (0x3c4), region = 32 }
  0x44   : > { %s226_s18 = sand.u32 1, %s2203_s19  }
  0x45   : > { %s1710_s30 = sshll.u32 %s226_s18, 7  ;;  %s227_s5 = scalar_lea.sflag [#allocation6], %s226_s18 }
  0x46   : > { %s2410_s10 = scalar_lea.vmem [#allocation5], %s1710_s30 }
  0x47   : > { %2178 = dma.done.wait (%p2341_p8), %s227_s5, 2048  }
  0x48   : > { %2180 = vsyncadd (%p2341_p8), %s227_s5, 4294965248  ;;  %s1712_s28 = sshll.u32 %s2215_s22, 4  ;;  %v2233_v0 = vmov 0   ;;  %v1913_v1 = vld [vmem:[%s2410_s10 + $0x4] ss:$8 sps:$4 sm:$0xff]   ;;  %p1758_p8 = scmp.ne.s32.totalorder %s2211_s21, 0 }
  0x49   : > { %484 = vmatprep.mubr.bf16.mxu0 %v2233_v0  ;;  %524 = vmatprep.mubr.bf16.mxu1 %v2233_v0  ;;  %p271_p13 = scmp.lt.s32.totalorder %s1712_s28, 31  ;;  %v1915_v2 = vld [vmem:[%s2410_s10] ss:$8 sps:$4 sm:$0xff]   ;;  %v1916_v3 = vld [vmem:[%s2410_s10 + $0x14] ss:$8 sps:$4 sm:$0xff]   ;;  %vm697_vm0 = vcmask (!%p1758_p8), 7168  }
  0x4a   : > { %452 = vmatprep.subr.bf16.mxu0 %v1913_v1  ;;  %1786 = vmatprep.subr.bf16.mxu1 %v1913_v1  ;;  %v1918_v4 = vld [vmem:[%s2410_s10 + $0x10] ss:$8 sps:$4 sm:$0xff]   ;;  %v1919_v5 = vld [vmem:[%s2410_s10 + $0x24] ss:$8 sps:$4 sm:$0xff]   ;;  %v1921_v6 = vld [vmem:[%s2410_s10 + $0x20] ss:$8 sps:$4 sm:$0xff]  }
  0x4b   : > { %s3340_s28 = smov (!%p271_p13, %s1712_s28), 31  ;;  %453 = vmatpush1.bf16.msra.mxu0 %v1915_v2  ;;  %1794 = vmatpush1.bf16.msra.mxu1 %v1915_v2  ;;  %v1922_v7 = vld [vmem:[%s2410_s10 + $0x34] ss:$8 sps:$4 sm:$0xff]   ;;  %v1924_v8 = vld [vmem:[%s2410_s10 + $0x30] ss:$8 sps:$4 sm:$0xff]  }
  0x4c   : > { %s1715_s29 = sshll.u32 %s3340_s28, 3  ;;  %454 = vmatprep.subr.bf16.mxu0 %v1916_v3  ;;  %1787 = vmatprep.subr.bf16.mxu1 %v1916_v3  ;;  %s1713_s9 = sshll.u32 %s3340_s28, 2  ;;  %v1925_v9 = vld [vmem:[%s2410_s10 + $0x44] ss:$8 sps:$4 sm:$0xff]   ;;  %v1927_v14 = vld [vmem:[%s2410_s10 + $0x40] ss:$8 sps:$4 sm:$0xff]  }
  0x4d   : > { %s2423_s27 = scalar_lea.vmem %s3221_s4, %s1715_s29  ;;  %s281_s18 = scalar_lea.vmem %s3219_s2, %s1715_s29  ;;  %v1928_v18 = vld [vmem:[%s2410_s10 + $0x54] ss:$8 sps:$4 sm:$0xff]   ;;  %v1930_v28 = vld [vmem:[%s2410_s10 + $0x50] ss:$8 sps:$4 sm:$0xff]   ;;  %v1931_v29 = vld [vmem:[%s2410_s10 + $0x64] ss:$8 sps:$4 sm:$0xff]  }
  0x4e   : > { %s2437_s26 = scalar_lea.vmem %s3217_s0, %s1713_s9  ;;  %v2441_v10 = vld [vmem:[%s281_s18] sm:$0xff]  ;;  %v2443_v11 = vld [vmem:[%s281_s18 + $0x8] sm:$0xff]  ;;  %v2445_v12 = vld [vmem:[%s281_s18 + $0x10] sm:$0xff] }
  0x4f   : > { %455 = vmatpush1.bf16.msra.mxu0 %v1918_v4  ;;  %1795 = vmatpush1.bf16.msra.mxu1 %v1918_v4  ;;  %v2447_v13 = vld [vmem:[%s281_s18 + $0x18] sm:$0xff]  ;;  %v2450_v15 = vld [vmem:[%s281_s18 + $0x20] sm:$0xff]  ;;  %v2452_v16 = vld [vmem:[%s281_s18 + $0x28] sm:$0xff] }
  0x50   : > { %456 = vmatprep.subr.bf16.mxu0 %v1919_v5  ;;  %1788 = vmatprep.subr.bf16.mxu1 %v1919_v5  ;;  %v2454_v17 = vld [vmem:[%s281_s18 + $0x30] sm:$0xff]  ;;  %v2457_v19 = vld [vmem:[%s281_s18 + $0x38] sm:$0xff]  ;;  %v2459_v20 = vld [vmem:[%s281_s18 + $0x40] sm:$0xff] }
  0x51   : > { %v2461_v21 = vld [vmem:[%s281_s18 + $0x48] sm:$0xff]  ;;  %v2463_v22 = vld [vmem:[%s281_s18 + $0x50] sm:$0xff]  ;;  %v2465_v23 = vld [vmem:[%s281_s18 + $0x58] sm:$0xff] }
  0x52   : > { %v2467_v24 = vld [vmem:[%s281_s18 + $0x60] sm:$0xff]  ;;  %v2469_v25 = vld [vmem:[%s281_s18 + $0x68] sm:$0xff]  ;;  %v2471_v26 = vld [vmem:[%s281_s18 + $0x70] sm:$0xff] }
  0x53   : > { %457 = vmatpush1.bf16.msra.mxu0 %v1921_v6  ;;  %1796 = vmatpush1.bf16.msra.mxu1 %v1921_v6  ;;  %v2473_v27 = vld [vmem:[%s281_s18 + $0x78] sm:$0xff]  ;;  %v1933_v30 = vld [vmem:[%s2410_s10 + $0x60] ss:$8 sps:$4 sm:$0xff]   ;;  %v1941_v37 = vld [vmem:[%s2437_s26 + $0x10] sm:$0xff]  }
  0x54   : > { %458 = vmatprep.subr.bf16.mxu0 %v1922_v7  ;;  %1789 = vmatprep.subr.bf16.mxu1 %v1922_v7  ;;  %v1934_v31 = vld [vmem:[%s2410_s10 + $0x74] ss:$8 sps:$4 sm:$0xff]   ;;  %v1936_v32 = vld [vmem:[%s2410_s10 + $0x70] ss:$8 sps:$4 sm:$0xff]   ;;  %v1937_v33 = vld [vmem:[%s2437_s26] sm:$0xff]   ;;  %s260_s10 = sand.u32 1, %s2191_s16  }
  0x55   : > { %v1938_v34 = vld [vmem:[%s2437_s26 + $0x20] sm:$0xff]   ;;  %v1939_v35 = vld [vmem:[%s2437_s26 + $0x8] sm:$0xff]   ;;  %v1942_v38 = vld [vmem:[%s2437_s26 + $0x30] sm:$0xff]   ;;  %s1711_s28 = sshll.u32 %s260_s10, 7 }
  0x56   : > { %v1940_v36 = vld [vmem:[%s2437_s26 + $0x28] sm:$0xff]   ;;  %v1943_v39 = vld [vmem:[%s2437_s26 + $0x18] sm:$0xff]   ;;  %s2517_s29 = scalar_lea.vmem [#allocation8], %s1711_s28 }
  0x57   : > { %459 = vmatpush1.bf16.msra.mxu0 %v1924_v8  ;;  %1797 = vmatpush1.bf16.msra.mxu1 %v1924_v8  ;;  %v1944_v40 = vld [vmem:[%s2437_s26 + $0x38] sm:$0xff]  }
  0x58   : > { %460 = vmatprep.subr.bf16.mxu0 %v1925_v9  ;;  %1790 = vmatprep.subr.bf16.mxu1 %v1925_v9 }
  0x5b   : > { %461 = vmatpush1.bf16.msra.mxu0 %v1927_v14  ;;  %1798 = vmatpush1.bf16.msra.mxu1 %v1927_v14 }
  0x5c   : > { %462 = vmatprep.subr.bf16.mxu0 %v1928_v18  ;;  %1791 = vmatprep.subr.bf16.mxu1 %v1928_v18 }
  0x5f   : > { %463 = vmatpush1.bf16.msra.mxu0 %v1930_v28  ;;  %1799 = vmatpush1.bf16.msra.mxu1 %v1930_v28 }
  0x60   : > { %464 = vmatprep.subr.bf16.mxu0 %v1931_v29  ;;  %1792 = vmatprep.subr.bf16.mxu1 %v1931_v29 }
  0x63   : > { %465 = vmatpush1.bf16.msra.mxu0 %v1933_v30  ;;  %1800 = vmatpush1.bf16.msra.mxu1 %v1933_v30 }
  0x64   : > { %466 = vmatprep.subr.bf16.mxu0 %v1934_v31  ;;  %1793 = vmatprep.subr.bf16.mxu1 %v1934_v31 }
  0x67   : > { %467 = vmatpush1.bf16.msra.mxu0 %v1936_v32  ;;  %1801 = vmatpush1.bf16.msra.mxu1 %v1936_v32 }
  0x6a   : > { %485 = vmatmul.mubr.bf16.vlgmr.msra.gmra.mrb[0].mxu0 %v1937_v33  ;;  %525 = vmatmul.mubr.bf16.vlgmr.msra.gmra.mrb[0].mxu1 %v1938_v34 }
  0x6b   : > { %494 = vmatprep.mubr.bf16.mxu0 %v2233_v0  ;;  %534 = vmatprep.mubr.bf16.mxu1 %v2233_v0 }
  0x72   : > { %495 = vmatmul.mubr.bf16.gmra.mrb[4].mxu0 %v1939_v35  ;;  %535 = vmatmul.mubr.bf16.gmra.mrb[4].mxu1 %v1940_v36 }
  0x73   : > { %504 = vmatprep.mubr.bf16.mxu0 %v2233_v0  ;;  %544 = vmatprep.mubr.bf16.mxu1 %v2233_v0 }
  0x7a   : > { %505 = vmatmul.mubr.bf16.gmra.mrb[8].mxu0 %v1941_v37  ;;  %545 = vmatmul.mubr.bf16.gmra.mrb[8].mxu1 %v1942_v38 }
  0x7b   : > { %514 = vmatprep.mubr.bf16.mxu0 %v2233_v0  ;;  %554 = vmatprep.mubr.bf16.mxu1 %v2233_v0 }
  0x82   : > { %515 = vmatmul.mubr.bf16.gmra.mrb[12].mxu0 %v1943_v39  ;;  %555 = vmatmul.mubr.bf16.gmra.mrb[12].mxu1 %v1944_v40 }
 0x13d   : > { %v2497_v41 = vpop.f32.mrb[0].mxu0  ;;  %v2499_v42 = vpop.f32.mrb[0].mxu1 }
 0x13e   : > { %v2501_v43 = vpop.f32.mrb[1].mxu0  ;;  %v2503_v44 = vpop.f32.mrb[1].mxu1 }
 0x13f   : > { %v1769_v45 = vpack.c.bf16 %v2501_v43, %v2497_v41  ;;  %v1777_v46 = vpack.c.bf16 %v2503_v44, %v2499_v42  ;;  %v2509_v47 = vpop.f32.mrb[2].mxu0  ;;  %v2511_v48 = vpop.f32.mrb[2].mxu1 }
 0x140   : > { %v2513_v49 = vpop.f32.mrb[3].mxu0  ;;  %v2515_v50 = vpop.f32.mrb[3].mxu1 }
 0x141   : > { %661 = vst [vmem:[%s2517_s29] sm:$0xff] %v1769_v45  ;;  %669 = vst [vmem:[%s2517_s29 + $0x40] sm:$0xff] %v1777_v46  ;;  %v1770_v51 = vpack.c.bf16 %v2513_v49, %v2509_v47  ;;  %v1778_v52 = vpack.c.bf16 %v2515_v50, %v2511_v48  ;;  %v2234_v46 = vmov (!%p1758_p8), -inf  }
 0x142   : > { %698 = vst.msk [vmem:[#allocation2] sm:$0xff] (!%p1758_p8), %vm697_vm0, %v2234_v46  ;;  %699 = vst.msk [vmem:[#allocation2 + $0x8] sm:$0xff] (!%p1758_p8), %vm697_vm0, %v2234_v46 }
 0x143   : > { %662 = vst [vmem:[%s2517_s29 + $0x8] sm:$0xff] %v1770_v51  ;;  %670 = vst [vmem:[%s2517_s29 + $0x48] sm:$0xff] %v1778_v52  ;;  %v2235_v51 = vmov (!%p1758_p8), 0.0  }
 0x144   : > { %700 = vst.msk [vmem:[#allocation2 + $0x10] sm:$0xff] (!%p1758_p8), %vm697_vm0, %v2234_v46  ;;  %701 = vst.msk [vmem:[#allocation2 + $0x18] sm:$0xff] (!%p1758_p8), %vm697_vm0, %v2234_v46 }
 0x145   : > { %v2527_v53 = vpop.f32.mrb[4].mxu0  ;;  %v2529_v54 = vpop.f32.mrb[4].mxu1  ;;  %702 = vst.msk [vmem:[#allocation2 + $0x20] sm:$0xff] (!%p1758_p8), %vm697_vm0, %v2234_v46  ;;  %703 = vst.msk [vmem:[#allocation2 + $0x28] sm:$0xff] (!%p1758_p8), %vm697_vm0, %v2234_v46 }
 0x146   : > { %v2531_v55 = vpop.f32.mrb[5].mxu0  ;;  %v2533_v56 = vpop.f32.mrb[5].mxu1  ;;  %704 = vst.msk [vmem:[#allocation2 + $0x30] sm:$0xff] (!%p1758_p8), %vm697_vm0, %v2234_v46  ;;  %705 = vst.msk [vmem:[#allocation2 + $0x38] sm:$0xff] (!%p1758_p8), %vm697_vm0, %v2234_v46 }
 0x147   : > { %v1771_v57 = vpack.c.bf16 %v2531_v55, %v2527_v53  ;;  %v1779_v58 = vpack.c.bf16 %v2533_v56, %v2529_v54  ;;  %v2539_v59 = vpop.f32.mrb[6].mxu0  ;;  %v2541_v60 = vpop.f32.mrb[6].mxu1  ;;  %706 = vst.msk [vmem:[#allocation2 + $0x40] sm:$0xff] (!%p1758_p8), %vm697_vm0, %v2234_v46  ;;  %707 = vst.msk [vmem:[#allocation2 + $0x48] sm:$0xff] (!%p1758_p8), %vm697_vm0, %v2234_v46 }
 0x148   : > { %v2543_v61 = vpop.f32.mrb[7].mxu0  ;;  %v2545_v62 = vpop.f32.mrb[7].mxu1  ;;  %708 = vst.msk [vmem:[#allocation2 + $0x50] sm:$0xff] (!%p1758_p8), %vm697_vm0, %v2234_v46  ;;  %709 = vst.msk [vmem:[#allocation2 + $0x58] sm:$0xff] (!%p1758_p8), %vm697_vm0, %v2234_v46 }
 0x149   : > { %663 = vst [vmem:[%s2517_s29 + $0x10] sm:$0xff] %v1771_v57  ;;  %671 = vst [vmem:[%s2517_s29 + $0x50] sm:$0xff] %v1779_v58  ;;  %v1772_v63 = vpack.c.bf16 %v2543_v61, %v2539_v59  ;;  %v1780_v1 = vpack.c.bf16 %v2545_v62, %v2541_v60 }
 0x14a   : > { %710 = vst.msk [vmem:[#allocation2 + $0x60] sm:$0xff] (!%p1758_p8), %vm697_vm0, %v2234_v46  ;;  %711 = vst.msk [vmem:[#allocation2 + $0x68] sm:$0xff] (!%p1758_p8), %vm697_vm0, %v2234_v46 }
 0x14b   : > { %664 = vst [vmem:[%s2517_s29 + $0x18] sm:$0xff] %v1772_v63  ;;  %672 = vst [vmem:[%s2517_s29 + $0x58] sm:$0xff] %v1780_v1 }
 0x14c   : > { %712 = vst.msk [vmem:[#allocation2 + $0x70] sm:$0xff] (!%p1758_p8), %vm697_vm0, %v2234_v46  ;;  %713 = vst.msk [vmem:[#allocation2 + $0x78] sm:$0xff] (!%p1758_p8), %vm697_vm0, %v2234_v46 }
 0x14d   : > { %v2555_v2 = vpop.f32.mrb[8].mxu0  ;;  %v2557_v3 = vpop.f32.mrb[8].mxu1  ;;  %714 = vst.msk [vmem:[#allocation3] sm:$0xff] (!%p1758_p8), %vm697_vm0, %v2235_v51  ;;  %715 = vst.msk [vmem:[#allocation3 + $0x8] sm:$0xff] (!%p1758_p8), %vm697_vm0, %v2235_v51 }
 0x14e   : > { %v2559_v4 = vpop.f32.mrb[9].mxu0  ;;  %v2561_v5 = vpop.f32.mrb[9].mxu1  ;;  %716 = vst.msk [vmem:[#allocation3 + $0x10] sm:$0xff] (!%p1758_p8), %vm697_vm0, %v2235_v51  ;;  %717 = vst.msk [vmem:[#allocation3 + $0x18] sm:$0xff] (!%p1758_p8), %vm697_vm0, %v2235_v51 }
 0x14f   : > { %v1773_v6 = vpack.c.bf16 %v2559_v4, %v2555_v2  ;;  %v1781_v7 = vpack.c.bf16 %v2561_v5, %v2557_v3  ;;  %v2567_v8 = vpop.f32.mrb[10].mxu0  ;;  %v2569_v9 = vpop.f32.mrb[10].mxu1  ;;  %718 = vst.msk [vmem:[#allocation3 + $0x20] sm:$0xff] (!%p1758_p8), %vm697_vm0, %v2235_v51  ;;  %719 = vst.msk [vmem:[#allocation3 + $0x28] sm:$0xff] (!%p1758_p8), %vm697_vm0, %v2235_v51 }
 0x150   : > { %v2571_v14 = vpop.f32.mrb[11].mxu0  ;;  %v2573_v18 = vpop.f32.mrb[11].mxu1  ;;  %720 = vst.msk [vmem:[#allocation3 + $0x30] sm:$0xff] (!%p1758_p8), %vm697_vm0, %v2235_v51  ;;  %721 = vst.msk [vmem:[#allocation3 + $0x38] sm:$0xff] (!%p1758_p8), %vm697_vm0, %v2235_v51 }
 0x151   : > { %665 = vst [vmem:[%s2517_s29 + $0x20] sm:$0xff] %v1773_v6  ;;  %673 = vst [vmem:[%s2517_s29 + $0x60] sm:$0xff] %v1781_v7  ;;  %v1774_v28 = vpack.c.bf16 %v2571_v14, %v2567_v8  ;;  %v1782_v29 = vpack.c.bf16 %v2573_v18, %v2569_v9 }
 0x152   : > { %722 = vst.msk [vmem:[#allocation3 + $0x40] sm:$0xff] (!%p1758_p8), %vm697_vm0, %v2235_v51  ;;  %723 = vst.msk [vmem:[#allocation3 + $0x48] sm:$0xff] (!%p1758_p8), %vm697_vm0, %v2235_v51 }
 0x153   : > { %666 = vst [vmem:[%s2517_s29 + $0x28] sm:$0xff] %v1774_v28  ;;  %674 = vst [vmem:[%s2517_s29 + $0x68] sm:$0xff] %v1782_v29 }
 0x154   : > { %724 = vst.msk [vmem:[#allocation3 + $0x50] sm:$0xff] (!%p1758_p8), %vm697_vm0, %v2235_v51  ;;  %725 = vst.msk [vmem:[#allocation3 + $0x58] sm:$0xff] (!%p1758_p8), %vm697_vm0, %v2235_v51 }
 0x155   : > { %v2583_v30 = vpop.f32.mrb[12].mxu0  ;;  %v2585_v31 = vpop.f32.mrb[12].mxu1  ;;  %696 = sbr.rel (%p1758_p8) target bundleno = 353 (0x161), region = 40  ;;  %726 = vst.msk [vmem:[#allocation3 + $0x60] sm:$0xff] (!%p1758_p8), %vm697_vm0, %v2235_v51  ;;  %727 = vst.msk [vmem:[#allocation3 + $0x68] sm:$0xff] (!%p1758_p8), %vm697_vm0, %v2235_v51 }
 0x156   : > { %v2587_v32 = vpop.f32.mrb[13].mxu0  ;;  %v2589_v33 = vpop.f32.mrb[13].mxu1  ;;  %728 = vst.msk [vmem:[#allocation3 + $0x70] sm:$0xff] (!%p1758_p8), %vm697_vm0, %v2235_v51  ;;  %729 = vst.msk [vmem:[#allocation3 + $0x78] sm:$0xff] (!%p1758_p8), %vm697_vm0, %v2235_v51 }
 0x157   : > { %v1775_v34 = vpack.c.bf16 %v2587_v32, %v2583_v30  ;;  %v1783_v35 = vpack.c.bf16 %v2589_v33, %v2585_v31  ;;  %v2595_v36 = vpop.f32.mrb[14].mxu0  ;;  %v2597_v37 = vpop.f32.mrb[14].mxu1  ;;  %730 = vst.msk [vmem:[#allocation4] sm:$0xff] (!%p1758_p8), %vm697_vm0, %v2235_v51  ;;  %731 = vst.msk [vmem:[#allocation4 + $0x8] sm:$0xff] (!%p1758_p8), %vm697_vm0, %v2235_v51 }
 0x158   : > { %v2599_v38 = vpop.f32.mrb[15].mxu0  ;;  %v2601_v39 = vpop.f32.mrb[15].mxu1  ;;  %732 = vst.msk [vmem:[#allocation4 + $0x10] sm:$0xff] (!%p1758_p8), %vm697_vm0, %v2235_v51  ;;  %733 = vst.msk [vmem:[#allocation4 + $0x18] sm:$0xff] (!%p1758_p8), %vm697_vm0, %v2235_v51 }
 0x159   : > { %667 = vst [vmem:[%s2517_s29 + $0x30] sm:$0xff] %v1775_v34  ;;  %675 = vst [vmem:[%s2517_s29 + $0x70] sm:$0xff] %v1783_v35  ;;  %v1776_v40 = vpack.c.bf16 %v2599_v38, %v2595_v36  ;;  %v1784_v45 = vpack.c.bf16 %v2601_v39, %v2597_v37 }
 0x15a   : > { %734 = vst.msk [vmem:[#allocation4 + $0x20] sm:$0xff] (!%p1758_p8), %vm697_vm0, %v2235_v51  ;;  %735 = vst.msk [vmem:[#allocation4 + $0x28] sm:$0xff] (!%p1758_p8), %vm697_vm0, %v2235_v51 }
 0x15b   : > { %668 = vst [vmem:[%s2517_s29 + $0x38] sm:$0xff] %v1776_v40  ;;  %676 = vst [vmem:[%s2517_s29 + $0x78] sm:$0xff] %v1784_v45 }
 0x15c   : > { %736 = vst.msk [vmem:[#allocation4 + $0x30] sm:$0xff] %vm697_vm0, %v2235_v51  ;;  %737 = vst.msk [vmem:[#allocation4 + $0x38] sm:$0xff] %vm697_vm0, %v2235_v51 }
 0x15d   : > { %738 = vst.msk [vmem:[#allocation4 + $0x40] sm:$0xff] %vm697_vm0, %v2235_v51  ;;  %739 = vst.msk [vmem:[#allocation4 + $0x48] sm:$0xff] %vm697_vm0, %v2235_v51 }
 0x15e   : > { %740 = vst.msk [vmem:[#allocation4 + $0x50] sm:$0xff] %vm697_vm0, %v2235_v51  ;;  %741 = vst.msk [vmem:[#allocation4 + $0x58] sm:$0xff] %vm697_vm0, %v2235_v51 }
 0x15f   : > { %742 = vst.msk [vmem:[#allocation4 + $0x60] sm:$0xff] %vm697_vm0, %v2235_v51  ;;  %743 = vst.msk [vmem:[#allocation4 + $0x68] sm:$0xff] %vm697_vm0, %v2235_v51 }
 0x160   : > { %744 = vst.msk [vmem:[#allocation4 + $0x70] sm:$0xff] %vm697_vm0, %v2235_v51  ;;  %745 = vst.msk [vmem:[#allocation4 + $0x78] sm:$0xff] %vm697_vm0, %v2235_v51 }
 0x161 PF: > { %v768_v52 = vmax.f32 %v2527_v53, %v2531_v55  ;;  %v762_v57 = vmax.f32 %v2497_v41, %v2501_v43  ;;  %1945 = vset.pattern.permute.xlu1 %v2233_v0  ;;  %1946 = vset.pattern.permute.xlu0 %v2233_v0  ;;  %v771_v58 = vmax.f32 %v2539_v59, %v2543_v61  ;;  %s1759_s8 = sshll.u32 %s2211_s21, 8  ;;  %vm1146_vm1 = vcmask 7168   ;;  %p1760_p2 = scmp.ne.s32.totalorder %s2211_s21, 3 }
 0x162   : > { %v765_v63 = vmax.f32 %v2509_v47, %v2513_v49  ;;  %v777_v1 = vmax.f32 %v2567_v8, %v2571_v14  ;;  %v774_v6 = vmax.f32 %v2555_v2, %v2559_v4  ;;  %v783_v0 = vmax.f32 %v2595_v36, %v2599_v38 }
 0x163   : > { %769 = vmax.xlane.f32.xlu1 %v768_v52  ;;  %763 = vmax.xlane.f32.xlu0 %v762_v57  ;;  %v780_v7 = vmax.f32 %v2583_v30, %v2587_v32  ;;  %v789_v28 = vmax.f32 %v2511_v48, %v2515_v50  ;;  %v786_v29 = vmax.f32 %v2499_v42, %v2503_v44  ;;  %v2695_v52 = vstv %s1759_s8 }
 0x164   : > { %v795_v34 = vmax.f32 %v2541_v60, %v2545_v62  ;;  %v792_v35 = vmax.f32 %v2529_v54, %v2533_v56  ;;  %v801_v40 = vmax.f32 %v2569_v9, %v2573_v18  ;;  %v798_v45 = vmax.f32 %v2557_v3, %v2561_v5 }
 0x165   : > { %v807_v46 = vmax.f32 %v2597_v37, %v2601_v39  ;;  %v804_v51 = vmax.f32 %v2585_v31, %v2589_v33  ;;  %v1184_v57 = vsub.s32 %v2441_v10, %v2695_v52  ;;  %v1191_v10 = vsub.s32 %v2457_v19, %v2695_v52  ;;  %v2725_v19 = vld [vmem:[#allocation2 + $0x8] sm:$0xff] }
 0x166   : > { %3258 = vst [vmem:[#allocation15_spill] sm:$0xff] %v2725_v19 }
 0x167   : > { %772 = vmax.xlane.f32.xlu1 %v771_v58  ;;  %766 = vmax.xlane.f32.xlu0 %v765_v63  ;;  %v1186_v58 = vsub.s32 %v2445_v12, %v2695_v52  ;;  %v1185_v63 = vsub.s32 %v2443_v11, %v2695_v52  ;;  %v1193_v11 = vsub.s32 %v2461_v21, %v2695_v52  ;;  %v2713_v12 = vld [vmem:[#allocation2 + $0x10] sm:$0xff] }
 0x168   : > { %3256 = vst [vmem:[#allocation13_spill] sm:$0xff] %v2713_v12 }
 0x16b   : > { %778 = vmax.xlane.f32.xlu1 %v777_v1  ;;  %775 = vmax.xlane.f32.xlu0 %v774_v6  ;;  %v1187_v1 = vsub.s32 %v2447_v13, %v2695_v52  ;;  %v1188_v6 = vsub.s32 %v2450_v15, %v2695_v52  ;;  %v2715_v13 = vld [vmem:[#allocation2] sm:$0xff] }
 0x16f   : > { %784 = vmax.xlane.f32.xlu1 %v783_v0  ;;  %781 = vmax.xlane.f32.xlu0 %v780_v7  ;;  %v1189_v0 = vsub.s32 %v2452_v16, %v2695_v52 }
 0x173   : > { %790 = vmax.xlane.f32.xlu1 %v789_v28  ;;  %787 = vmax.xlane.f32.xlu0 %v786_v29  ;;  %v2723_v29 = vld [vmem:[#allocation2 + $0x18] sm:$0xff] }
 0x177   : > { %796 = vmax.xlane.f32.xlu1 %v795_v34  ;;  %793 = vmax.xlane.f32.xlu0 %v792_v35 }
 0x17b   : > { %802 = vmax.xlane.f32.xlu1 %v801_v40  ;;  %799 = vmax.xlane.f32.xlu0 %v798_v45 }
 0x17f   : > { %808 = vmax.xlane.f32.xlu1 %v807_v46  ;;  %805 = vmax.xlane.f32.xlu0 %v804_v51  ;;  %v2742_v51 = vld [vmem:[#allocation2 + $0x28] sm:$0xff] }
 0x190   : > { %1201 = vperm.xlu1 %1945, %v1184_v57   ;;  %v2744_v57 = vld [vmem:[#allocation2 + $0x20] sm:$0xff] }
 0x191   : > { %3260 = vst [vmem:[#allocation17_spill] sm:$0xff] %v2744_v57 }
 0x194   : > { %1207 = vperm.xlu1 %1945, %v1186_v58   ;;  %v2799_v58 = vld [vmem:[#allocation2 + $0x58] sm:$0xff] }
 0x195   : > { %1204 = vperm.xlu0 %1946, %v1185_v63   ;;  %v2780_v63 = vld [vmem:[#allocation2 + $0x48] sm:$0xff]  ;;  %3268 = vst [vmem:[#allocation25_spill] sm:$0xff] %v2799_v58 }
 0x196   : > { %3264 = vst [vmem:[#allocation21_spill] sm:$0xff] %v2780_v63 }
 0x198   : > { %1210 = vperm.xlu1 %1945, %v1187_v1  }
 0x199   : > { %1213 = vperm.xlu0 %1946, %v1188_v6  }
 0x19c   : > { %1216 = vperm.xlu1 %1945, %v1189_v0  }
 0x1a0   : > { %1222 = vperm.xlu1 %1945, %v1191_v10  }
 0x1a4   : > { %1228 = vperm.xlu1 %1945, %v1193_v11   ;;  %v2761_v11 = vld [vmem:[#allocation2 + $0x38] sm:$0xff] }
 0x1f0   : > { %v770_v15 = vpop.xlane.xlu1 %769  ;;  %v764_v7 = vpop.xlane.xlu0 %763 }
 0x1f1   : > { %v2718_v28 = vmax.f32 %v2713_v12, %v770_v15  ;;  %v2721_v16 = vmax.f32 %v2715_v13, %v764_v7  ;;  %v2763_v15 = vld [vmem:[#allocation2 + $0x30] sm:$0xff]  ;;  %v2782_v7 = vld [vmem:[#allocation2 + $0x40] sm:$0xff] }
 0x1f2   : > { %3262 = vst [vmem:[#allocation19_spill] sm:$0xff] %v2763_v15  ;;  %3265 = vst [vmem:[#allocation22_spill] sm:$0xff] %v2782_v7 }
 0x1f3   : > { %3257 = vst [vmem:[#allocation14_spill] sm:$0xff] %v2718_v28  ;;  %1165 = vst.msk [vmem:[#allocation2 + $0x10] sm:$0xff] %vm1146_vm1, %v2718_v28  ;;  %908 = vperm.xlu0 %1946, %v2721_v16  }
 0x1f4   : > { %1163 = vst.msk [vmem:[#allocation2] sm:$0xff] %vm1146_vm1, %v2721_v16  ;;  %v773_v35 = vpop.xlane.xlu1 %772  ;;  %v767_v40 = vpop.xlane.xlu0 %766 }
 0x1f5   : > { %v2737_v45 = vmax.f32 %v2723_v29, %v773_v35  ;;  %v2740_v46 = vmax.f32 %v2725_v19, %v767_v40 }
 0x1f7   : > { %3259 = vst [vmem:[#allocation16_spill] sm:$0xff] %v2740_v46  ;;  %1166 = vst.msk [vmem:[#allocation2 + $0x18] sm:$0xff] %vm1146_vm1, %v2737_v45  ;;  %913 = vperm.xlu1 %1945, %v2740_v46  }
 0x1f8   : > { %1164 = vst.msk [vmem:[#allocation2 + $0x8] sm:$0xff] %vm1146_vm1, %v2740_v46  ;;  %v779_v1 = vpop.xlane.xlu1 %778  ;;  %v776_v6 = vpop.xlane.xlu0 %775  ;;  %v2821_v46 = vld [vmem:[#allocation2 + $0x60] sm:$0xff] }
 0x1f9   : > { %v2756_v0 = vmax.f32 %v2742_v51, %v779_v1  ;;  %v2759_v10 = vmax.f32 %v2744_v57, %v776_v6  ;;  %3273 = vst [vmem:[#allocation30_spill] sm:$0xff] %v2821_v46 }
 0x1fb   : > { %3261 = vst [vmem:[#allocation18_spill] sm:$0xff] %v2759_v10  ;;  %1168 = vst.msk [vmem:[#allocation2 + $0x28] sm:$0xff] %vm1146_vm1, %v2756_v0  ;;  %918 = vperm.xlu1 %1945, %v2718_v28   ;;  %v2801_v28 = vld [vmem:[#allocation2 + $0x50] sm:$0xff] }
 0x1fc   : > { %1167 = vst.msk [vmem:[#allocation2 + $0x20] sm:$0xff] %vm1146_vm1, %v2759_v10  ;;  %v785_v40 = vpop.xlane.xlu1 %784  ;;  %v782_v1 = vpop.xlane.xlu0 %781  ;;  %3269 = vst [vmem:[#allocation26_spill] sm:$0xff] %v2801_v28 }
 0x1fd   : > { %v2775_v6 = vmax.f32 %v2761_v11, %v785_v40  ;;  %v2778_v21 = vmax.f32 %v2763_v15, %v782_v1 }
 0x1ff   : > { %3263 = vst [vmem:[#allocation20_spill] sm:$0xff] %v2778_v21  ;;  %1170 = vst.msk [vmem:[#allocation2 + $0x38] sm:$0xff] %vm1146_vm1, %v2775_v6  ;;  %923 = vperm.xlu1 %1945, %v2737_v45  }
 0x200   : > { %1169 = vst.msk [vmem:[#allocation2 + $0x30] sm:$0xff] %vm1146_vm1, %v2778_v21  ;;  %v791_v40 = vpop.xlane.xlu1 %790  ;;  %v788_v1 = vpop.xlane.xlu0 %787 }
 0x201   : > { %v2794_v34 = vmax.f32 %v2780_v63, %v791_v40  ;;  %v2797_v57 = vmax.f32 %v2782_v7, %v788_v1  ;;  %v2819_v63 = vld [vmem:[#allocation2 + $0x68] sm:$0xff] }
 0x202   : > { %3272 = vst [vmem:[#allocation29_spill] sm:$0xff] %v2819_v63 }
 0x203   : > { %3266 = vst [vmem:[#allocation23_spill] sm:$0xff] %v2794_v34  ;;  %3267 = vst [vmem:[#allocation24_spill] sm:$0xff] %v2797_v57  ;;  %928 = vperm.xlu1 %1945, %v2759_v10   ;;  %953 = vperm.xlu0 %1946, %v2794_v34   ;;  %v2841_v10 = vld [vmem:[#allocation2 + $0x70] sm:$0xff] }
 0x204   : > { %1172 = vst.msk [vmem:[#allocation2 + $0x48] sm:$0xff] %vm1146_vm1, %v2794_v34  ;;  %1171 = vst.msk [vmem:[#allocation2 + $0x40] sm:$0xff] %vm1146_vm1, %v2797_v57  ;;  %v797_v1 = vpop.xlane.xlu1 %796  ;;  %v794_v35 = vpop.xlane.xlu0 %793 }
 0x205   : > { %v2814_v15 = vmax.f32 %v2799_v58, %v797_v1  ;;  %v2817_v12 = vmax.f32 %v2801_v28, %v794_v35  ;;  %v2839_v58 = vld [vmem:[#allocation2 + $0x78] sm:$0xff]  ;;  %3277 = vst [vmem:[#allocation34_spill] sm:$0xff] %v2841_v10 }
 0x206   : > { %3276 = vst [vmem:[#allocation33_spill] sm:$0xff] %v2839_v58 }
 0x207   : > { %3270 = vst [vmem:[#allocation27_spill] sm:$0xff] %v2814_v15  ;;  %3271 = vst [vmem:[#allocation28_spill] sm:$0xff] %v2817_v12  ;;  %933 = vperm.xlu1 %1945, %v2756_v0   ;;  %963 = vperm.xlu0 %1946, %v2814_v15  }
 0x208   : > { %1174 = vst.msk [vmem:[#allocation2 + $0x58] sm:$0xff] %vm1146_vm1, %v2814_v15  ;;  %1173 = vst.msk [vmem:[#allocation2 + $0x50] sm:$0xff] %vm1146_vm1, %v2817_v12  ;;  %v803_v35 = vpop.xlane.xlu1 %802  ;;  %v800_v40 = vpop.xlane.xlu0 %799 }
 0x209   : > { %v2834_v7 = vmax.f32 %v2819_v63, %v803_v35  ;;  %v2837_v34 = vmax.f32 %v2821_v46, %v800_v40  ;;  %v1179_v35 = vlaneseq }
 0x20b   : > { %3274 = vst [vmem:[#allocation31_spill] sm:$0xff] %v2834_v7  ;;  %3275 = vst [vmem:[#allocation32_spill] sm:$0xff] %v2837_v34  ;;  %938 = vperm.xlu1 %1945, %v2778_v21   ;;  %973 = vperm.xlu0 %1946, %v2834_v7   ;;  %v1195_v21 = vsub.s32 %v2465_v23, %v2695_v52 }
 0x20c   : > { %1176 = vst.msk [vmem:[#allocation2 + $0x68] sm:$0xff] %vm1146_vm1, %v2834_v7  ;;  %1175 = vst.msk [vmem:[#allocation2 + $0x60] sm:$0xff] %vm1146_vm1, %v2837_v34  ;;  %v809_v40 = vpop.xlane.xlu1 %808  ;;  %v806_v1 = vpop.xlane.xlu0 %805 }
 0x20d   : > { %v2854_v19 = vmax.f32 %v2839_v58, %v809_v40  ;;  %v2857_v15 = vmax.f32 %v2841_v10, %v806_v1  ;;  %v2868_v40 = vand.u32 127, %v1179_v35 }
 0x20f   : > { %3278 = vst [vmem:[#allocation35_spill] sm:$0xff] %v2854_v19  ;;  %3279 = vst [vmem:[#allocation36_spill] sm:$0xff] %v2857_v15  ;;  %943 = vperm.xlu1 %1945, %v2775_v6   ;;  %v2872_v1 = vadd.s32 128, %v2868_v40 }
 0x210   : > { %1178 = vst.msk [vmem:[#allocation2 + $0x78] sm:$0xff] %vm1146_vm1, %v2854_v19  ;;  %1177 = vst.msk [vmem:[#allocation2 + $0x70] sm:$0xff] %vm1146_vm1, %v2857_v15  ;;  %v1202_v46 = vpop.permute.xlu1 %1201 }
 0x211   : > { %vm1248_vm2 = vcmp.eq.s32.totalorder %v2868_v40, %v1202_v46  ;;  %vm1249_vm3 = vcmp.eq.s32.totalorder %v2872_v1, %v1202_v46  ;;  %v1199_v46 = vsub.s32 %v2473_v27, %v2695_v52  ;;  %v1190_v27 = vsub.s32 %v2454_v17, %v2695_v52 }
 0x212   : > { %v1297_v35 = vsel %vm1249_vm3, %v2501_v43, 0.0  ;;  %v1194_v17 = vsub.s32 %v2463_v22, %v2695_v52 }
 0x213   : > { %948 = vperm.xlu1 %1945, %v2797_v57   ;;  %v1296_v57 = vsel %vm1248_vm2, %v2497_v41, 0.0 }
 0x214   : > { %v1205_v10 = vpop.permute.xlu0 %1204  ;;  %v1208_v58 = vpop.permute.xlu1 %1207 }
 0x215   : > { %vm1252_vm4 = vcmp.eq.s32.totalorder %v2868_v40, %v1208_v58  ;;  %vm1253_vm5 = vcmp.eq.s32.totalorder %v2872_v1, %v1208_v58  ;;  %vm1250_vm8 = vcmp.eq.s32.totalorder %v2868_v40, %v1205_v10  ;;  %vm1251_vm9 = vcmp.eq.s32.totalorder %v2872_v1, %v1205_v10 }
 0x216   : > { %v1300_v7 = vsel %vm1252_vm4, %v2527_v53, 0.0  ;;  %v1301_v63 = vsel %vm1253_vm5, %v2531_v55, 0.0 }
 0x217   : > { %958 = vperm.xlu1 %1945, %v2817_v12  }
 0x218   : > { %v1214_v23 = vpop.permute.xlu0 %1213  ;;  %v1211_v58 = vpop.permute.xlu1 %1210 }
 0x219   : > { %vm1256_vm6 = vcmp.eq.s32.totalorder %v2868_v40, %v1214_v23  ;;  %vm1257_vm7 = vcmp.eq.s32.totalorder %v2872_v1, %v1214_v23  ;;  %vm1254_vm10 = vcmp.eq.s32.totalorder %v2868_v40, %v1211_v58  ;;  %vm1255_vm11 = vcmp.eq.s32.totalorder %v2872_v1, %v1211_v58 }
 0x21a   : > { %v1302_v10 = vsel %vm1254_vm10, %v2539_v59, 0.0  ;;  %v1198_v58 = vsub.s32 %v2471_v26, %v2695_v52 }
 0x21b   : > { %968 = vperm.xlu1 %1945, %v2837_v34   ;;  %v1197_v34 = vsub.s32 %v2469_v25, %v2695_v52  ;;  %v1334_v25 = vadd.f32 %v1301_v63, %v1300_v7  ;;  %v1192_v63 = vsub.s32 %v2459_v20, %v2695_v52  ;;  %v1299_v7 = vsel %vm1251_vm9, %v2513_v49, 0.0 }
 0x21c   : > { %v1196_v20 = vsub.s32 %v2467_v24, %v2695_v52 }
 0x21f   : > { %978 = vperm.xlu1 %1945, %v2857_v15   ;;  %v1328_v15 = vadd.f32 %v1297_v35, %v1296_v57  ;;  %v1305_v57 = vsel %vm1257_vm7, %v2559_v4, 0.0  ;;  %v1217_v35 = vpop.permute.xlu1 %1216 }
 0x220   : > { %vm1258_vm12 = vcmp.eq.s32.totalorder %v2868_v40, %v1217_v35  ;;  %vm1259_vm13 = vcmp.eq.s32.totalorder %v2872_v1, %v1217_v35 }
 0x221   : > { %v1307_v22 = vsel %vm1259_vm13, %v2571_v14, 0.0 }
 0x223   : > { %1234 = vperm.xlu1 %1945, %v1195_v21   ;;  %v1304_v21 = vsel %vm1256_vm6, %v2555_v2, 0.0 }
 0x227   : > { %1240 = vperm.xlu1 %1945, %v1197_v34   ;;  %v1340_v34 = vadd.f32 %v1305_v57, %v1304_v21  ;;  %v1306_v57 = vsel %vm1258_vm12, %v2567_v8, 0.0 }
 0x22a   : > { %1329 = vadd.xlane.f32.xlu0 %v1328_v15  ;;  %v1298_v15 = vsel %vm1250_vm8, %v2509_v47, 0.0 }
 0x22b   : > { %1246 = vperm.xlu1 %1945, %v1199_v46   ;;  %v1331_v23 = vadd.f32 %v1299_v7, %v1298_v15  ;;  %v1303_v46 = vsel %vm1255_vm11, %v2543_v61, 0.0 }
 0x22c   : > { %v1337_v21 = vadd.f32 %v1303_v46, %v1302_v10 }
 0x22e   : > { %1335 = vadd.xlane.f32.xlu0 %v1334_v25  ;;  %v1223_v25 = vpop.permute.xlu1 %1222 }
 0x22f   : > { %vm1262_vm14 = vcmp.eq.s32.totalorder %v2868_v40, %v1223_v25  ;;  %vm1263_vm15 = vcmp.eq.s32.totalorder %v2872_v1, %v1223_v25 }
 0x230   : > { %v1310_v35 = vsel %vm1262_vm14, %v2595_v36, 0.0  ;;  %v1311_v24 = vsel %vm1263_vm15, %v2599_v38, 0.0 }
 0x232   : > { %1341 = vadd.xlane.f32.xlu0 %v1340_v34  ;;  %v1229_v34 = vpop.permute.xlu1 %1228 }
 0x233   : > { %vm1266_vm0 = vcmp.eq.s32.totalorder %v2868_v40, %v1229_v34  ;;  %vm1267_vm2 = vcmp.eq.s32.totalorder %v2872_v1, %v1229_v34 }
 0x234   : > { %v1314_v15 = vsel %vm1266_vm0, %v2511_v48, 0.0  ;;  %v1315_v7 = vsel %vm1267_vm2, %v2515_v50, 0.0 }
 0x235   : > { %v1355_v26 = vadd.f32 %v1315_v7, %v1314_v15 }
 0x248   : > { %1219 = vperm.xlu0 %1946, %v1190_v27   ;;  %v1343_v27 = vadd.f32 %v1307_v22, %v1306_v57 }
 0x24c   : > { %1225 = vperm.xlu0 %1946, %v1192_v63   ;;  %v1349_v63 = vadd.f32 %v1311_v24, %v1310_v35 }
 0x24f   : > { %1332 = vadd.xlane.f32.xlu1 %v1331_v23 }
 0x250   : > { %1231 = vperm.xlu0 %1946, %v1194_v17  }
 0x253   : > { %1338 = vadd.xlane.f32.xlu1 %v1337_v21 }
 0x254   : > { %1237 = vperm.xlu0 %1946, %v1196_v20  }
 0x257   : > { %1344 = vadd.xlane.f32.xlu1 %v1343_v27 }
 0x258   : > { %1243 = vperm.xlu0 %1946, %v1198_v58  }
 0x25b   : > { %1350 = vadd.xlane.f32.xlu1 %v1349_v63 }
 0x25c   : > { %983 = vperm.xlu0 %1946, %v2854_v19  }
 0x25f   : > { %1356 = vadd.xlane.f32.xlu1 %v1355_v26 }
 0x272   : > { %v909_v57 = vpop.permute.xlu0 %908 }
 0x273   : > { %v986_v34 = vsub.f32 %v2497_v41, %v909_v57  ;;  %v987_v58 = vsub.f32 %v2501_v43, %v909_v57 }
 0x275   : > { %v1018_v35 = vmul.f32 1.442695, %v986_v34  ;;  %v1020_v63 = vmul.f32 1.442695, %v987_v58 }
 0x276   : > { %v2924_v52 = vpop.permute.xlu1 %913 }
 0x277   : > { %1947 = vpow2.f32 %v1018_v35 }
 0x278   : > { %1949 = vpow2.f32 %v1020_v63 }
 0x27a   : > { %v2926_v17 = vpop.permute.xlu1 %918 }
 0x27e   : > { %v924_v23 = vpop.permute.xlu1 %923 }
 0x27f   : > { %v992_v24 = vsub.f32 %v2539_v59, %v924_v23  ;;  %v993_v15 = vsub.f32 %v2543_v61, %v924_v23 }
 0x281   : > { %v1030_v41 = vmul.f32 1.442695, %v992_v24  ;;  %v1032_v43 = vmul.f32 1.442695, %v993_v15  ;;  %v1948_v15 = vpop.eup %1947 }
 0x282   : > { %v2928_v10 = vpop.permute.xlu1 %928  ;;  %v2940_v7 = vpop.permute.xlu0 %953 }
 0x283   : > { %1951 = vpow2.f32 %v1030_v41 }
 0x284   : > { %1953 = vpow2.f32 %v1032_v43 }
 0x286   : > { %v934_v46 = vpop.permute.xlu1 %933  ;;  %v2946_v34 = vpop.permute.xlu0 %963 }
 0x287   : > { %v996_v26 = vsub.f32 %v2567_v8, %v934_v46  ;;  %v997_v19 = vsub.f32 %v2571_v14, %v934_v46 }
 0x289   : > { %v1038_v57 = vmul.f32 1.442695, %v996_v26  ;;  %v1040_v28 = vmul.f32 1.442695, %v997_v19 }
 0x28a   : > { %v2930_v25 = vpop.permute.xlu1 %938 }
 0x28b   : > { %1955 = vpow2.f32 %v1038_v57 }
 0x28c   : > { %1957 = vpow2.f32 %v1040_v28  ;;  %v1950_v28 = vpop.eup %1949 }
 0x28e   : > { %v944_v20 = vpop.permute.xlu1 %943 }
 0x28f   : > { %v1000_v61 = vsub.f32 %v2595_v36, %v944_v20  ;;  %v1001_v8 = vsub.f32 %v2599_v38, %v944_v20  ;;  %v974_v36 = vpop.permute.xlu0 %973 }
 0x290   : > { %v1012_v41 = vsub.f32 %v2569_v9, %v974_v36  ;;  %v1013_v57 = vsub.f32 %v2573_v18, %v974_v36 }
 0x291   : > { %v1046_v58 = vmul.f32 1.442695, %v1000_v61  ;;  %v1048_v24 = vmul.f32 1.442695, %v1001_v8  ;;  %v1952_v61 = vpop.eup %1951  ;;  %v1082_v8 = vadd.f32 %v1950_v28, %v1948_v15  ;;  %v1282_v15 = vld [vmem:[#allocation4 + $0x10] sm:$0xff] }
 0x292   : > { %v2932_v21 = vpop.permute.xlu1 %948 }
 0x293   : > { %1959 = vpow2.f32 %v1046_v58 }
 0x294   : > { %1961 = vpow2.f32 %v1048_v24 }
 0x296   : > { %v959_v22 = vpop.permute.xlu1 %958 }
 0x297   : > { %v1006_v35 = vsub.f32 %v2529_v54, %v959_v22  ;;  %v1007_v38 = vsub.f32 %v2533_v56, %v959_v22 }
 0x299   : > { %v1058_v43 = vmul.f32 1.442695, %v1006_v35  ;;  %v1280_v35 = vld [vmem:[#allocation4] sm:$0xff] }
 0x29a   : > { %v2936_v27 = vpop.permute.xlu1 %968 }
 0x29b   : > { %1963 = vpow2.f32 %v1058_v43 }
 0x29e   : > { %v2944_v12 = vpop.permute.xlu1 %978 }
 0x2a2   : > { %v1235_v59 = vpop.permute.xlu1 %1234 }
 0x2a3   : > { %vm1270_vm3 = vcmp.eq.s32.totalorder %v2868_v40, %v1235_v59  ;;  %vm1271_vm4 = vcmp.eq.s32.totalorder %v2872_v1, %v1235_v59  ;;  %v1060_v59 = vmul.f32 1.442695, %v1007_v38 }
 0x2a4   : > { %v1318_v14 = vsel %vm1270_vm3, %v2541_v60, 0.0  ;;  %v1319_v23 = vsel %vm1271_vm4, %v2545_v62, 0.0 }
 0x2a5   : > { %v1361_v46 = vadd.f32 %v1319_v23, %v1318_v14  ;;  %v1954_v14 = vpop.eup %1953  ;;  %v1070_v23 = vmul.f32 1.442695, %v1012_v41  ;;  %1965 = vpow2.f32 %v1060_v59  ;;  %v1284_v59 = vld [vmem:[#allocation4 + $0x20] sm:$0xff] }
 0x2a6   : > { %v1241_v19 = vpop.permute.xlu1 %1240  ;;  %v1956_v22 = vpop.eup %1955 }
 0x2a7   : > { %vm1274_vm5 = vcmp.eq.s32.totalorder %v2868_v40, %v1241_v19  ;;  %vm1275_vm6 = vcmp.eq.s32.totalorder %v2872_v1, %v1241_v19  ;;  %1362 = vadd.xlane.f32.xlu1 %v1361_v46  ;;  %v1958_v46 = vpop.eup %1957  ;;  %v1072_v19 = vmul.f32 1.442695, %v1013_v57  ;;  %1967 = vpow2.f32 %v1070_v23 }
 0x2a8   : > { %v1322_v20 = vsel %vm1274_vm5, %v2569_v9, 0.0  ;;  %v1323_v63 = vsel %vm1275_vm6, %v2573_v18, 0.0  ;;  %v1960_v9 = vpop.eup %1959  ;;  %v1097_v58 = vadd.f32 %v1958_v46, %v1956_v22  ;;  %v988_v23 = vsub.f32 %v2509_v47, %v2924_v52 }
 0x2a9   : > { %v1367_v26 = vadd.f32 %v1323_v63, %v1322_v20  ;;  %v1091_v20 = vadd.f32 %v1954_v14, %v1952_v61  ;;  %1969 = vpow2.f32 %v1072_v19  ;;  %v1962_v18 = vpop.eup %1961  ;;  %v989_v46 = vsub.f32 %v2513_v49, %v2924_v52 }
 0x2aa   : > { %v1964_v38 = vpop.eup %1963  ;;  %v1103_v63 = vadd.f32 %v1962_v18, %v1960_v9  ;;  %v990_v9 = vsub.f32 %v2527_v53, %v2926_v17  ;;  %v994_v49 = vsub.f32 %v2555_v2, %v2928_v10 }
 0x2ab   : > { %1368 = vadd.xlane.f32.xlu1 %v1367_v26 }
 0x2af   : > { %1083 = vadd.xlane.f32.xlu1 %v1082_v8  ;;  %v1966_v26 = vpop.eup %1965 }
 0x2b0   : > { %v1112_v57 = vadd.f32 %v1966_v26, %v1964_v38 }
 0x2b1   : > { %v1968_v43 = vpop.eup %1967 }
 0x2b3   : > { %1092 = vadd.xlane.f32.xlu1 %v1091_v20  ;;  %v1970_v61 = vpop.eup %1969  ;;  %v1022_v20 = vmul.f32 1.442695, %v988_v23 }
 0x2b4   : > { %v1121_v22 = vadd.f32 %v1970_v61, %v1968_v43 }
 0x2b5   : > { %1971 = vpow2.f32 %v1022_v20 }
 0x2b7   : > { %1098 = vadd.xlane.f32.xlu1 %v1097_v58  ;;  %v1330_v36 = vpop.xlane.xlu0 %1329  ;;  %v1024_v58 = vmul.f32 1.442695, %v989_v46 }
 0x2b8   : > { %v1376_v24 = vadd.f32 %v1330_v36, %v1280_v35  ;;  %v991_v35 = vsub.f32 %v2531_v55, %v2926_v17  ;;  %v995_v36 = vsub.f32 %v2559_v4, %v2928_v10  ;;  %v998_v4 = vsub.f32 %v2583_v30, %v2930_v25 }
 0x2b9   : > { %1973 = vpow2.f32 %v1024_v58  ;;  %v999_v10 = vsub.f32 %v2587_v32, %v2930_v25 }
 0x2ba   : > { %1392 = vst.msk [vmem:[#allocation4] sm:$0xff] %vm1146_vm1, %v1376_v24  ;;  %v1026_v24 = vmul.f32 1.442695, %v990_v9  ;;  %v1028_v55 = vmul.f32 1.442695, %v991_v35  ;;  %v1281_v9 = vld [vmem:[#allocation4 + $0x8] sm:$0xff] }
 0x2bb   : > { %1104 = vadd.xlane.f32.xlu1 %v1103_v63  ;;  %v1336_v28 = vpop.xlane.xlu0 %1335  ;;  %v1034_v63 = vmul.f32 1.442695, %v994_v49  ;;  %v1044_v61 = vmul.f32 1.442695, %v999_v10  ;;  %v1285_v10 = vld [vmem:[#allocation4 + $0x28] sm:$0xff] }
 0x2bc   : > { %v1378_v41 = vadd.f32 %v1336_v28, %v1282_v15  ;;  %v1036_v15 = vmul.f32 1.442695, %v995_v36  ;;  %1975 = vpow2.f32 %v1026_v24 }
 0x2bd   : > { %1977 = vpow2.f32 %v1028_v55 }
 0x2be   : > { %1394 = vst.msk [vmem:[#allocation4 + $0x10] sm:$0xff] %vm1146_vm1, %v1378_v41  ;;  %1979 = vpow2.f32 %v1034_v63 }
 0x2bf   : > { %1113 = vadd.xlane.f32.xlu1 %v1112_v57  ;;  %v1342_v8 = vpop.xlane.xlu0 %1341  ;;  %1981 = vpow2.f32 %v1036_v15  ;;  %v1972_v25 = vpop.eup %1971 }
 0x2c0   : > { %v1380_v14 = vadd.f32 %v1342_v8, %v1284_v59  ;;  %v1042_v59 = vmul.f32 1.442695, %v998_v4  ;;  %v1004_v8 = vsub.f32 %v2511_v48, %v2940_v7 }
 0x2c2   : > { %1396 = vst.msk [vmem:[#allocation4 + $0x20] sm:$0xff] %vm1146_vm1, %v1380_v14  ;;  %1983 = vpow2.f32 %v1042_v59  ;;  %v1054_v20 = vmul.f32 1.442695, %v1004_v8 }
 0x2c3   : > { %1122 = vadd.xlane.f32.xlu1 %v1121_v22  ;;  %v1974_v22 = vpop.eup %1973  ;;  %1985 = vpow2.f32 %v1044_v61  ;;  %v1287_v61 = vld [vmem:[#allocation4 + $0x38] sm:$0xff] }
 0x2c4   : > { %v1085_v58 = vadd.f32 %v1974_v22, %v1972_v25 }
 0x2c7   : > { %v1220_v19 = vpop.permute.xlu0 %1219 }
 0x2c8   : > { %vm1260_vm7 = vcmp.eq.s32.totalorder %v2868_v40, %v1220_v19  ;;  %vm1261_vm8 = vcmp.eq.s32.totalorder %v2872_v1, %v1220_v19  ;;  %v3007_v19 = vpop.permute.xlu1 %1246 }
 0x2c9   : > { %v1308_v18 = vsel %vm1260_vm7, %v2583_v30, 0.0  ;;  %v1309_v47 = vsel %vm1261_vm8, %v2587_v32, 0.0  ;;  %v1002_v30 = vsub.f32 %v2499_v42, %v2932_v21  ;;  %v1003_v32 = vsub.f32 %v2503_v44, %v2932_v21  ;;  %v1976_v21 = vpop.eup %1975 }
 0x2ca   : > { %v1346_v52 = vadd.f32 %v1309_v47, %v1308_v18  ;;  %v1978_v35 = vpop.eup %1977  ;;  %vm1278_vm15 = vcmp.eq.s32.totalorder %v2868_v40, %v3007_v19  ;;  %vm1279_vm0 = vcmp.eq.s32.totalorder %v2872_v1, %v3007_v19 }
 0x2cb   : > { %v1226_v53 = vpop.permute.xlu0 %1225  ;;  %v1050_v46 = vmul.f32 1.442695, %v1002_v30  ;;  %v1980_v47 = vpop.eup %1979  ;;  %v1088_v63 = vadd.f32 %v1978_v35, %v1976_v21  ;;  %v1327_v35 = vsel %vm1279_vm0, %v2601_v39, 0.0 }
 0x2cc   : > { %vm1264_vm9 = vcmp.eq.s32.totalorder %v2868_v40, %v1226_v53  ;;  %vm1265_vm10 = vcmp.eq.s32.totalorder %v2872_v1, %v1226_v53  ;;  %1347 = vadd.xlane.f32.xlu0 %v1346_v52  ;;  %v1982_v36 = vpop.eup %1981  ;;  %v1009_v53 = vsub.f32 %v2545_v62, %v2946_v34  ;;  %v1011_v62 = vsub.f32 %v2561_v5, %v2936_v27 }
 0x2cd   : > { %v1312_v17 = vsel %vm1264_vm9, %v2499_v42, 0.0  ;;  %v1313_v38 = vsel %vm1265_vm10, %v2503_v44, 0.0  ;;  %v1005_v42 = vsub.f32 %v2515_v50, %v2940_v7  ;;  %v1052_v44 = vmul.f32 1.442695, %v1003_v32  ;;  %v1984_v4 = vpop.eup %1983 }
 0x2ce   : > { %v1352_v2 = vadd.f32 %v1313_v38, %v1312_v17  ;;  %v1008_v50 = vsub.f32 %v2541_v60, %v2946_v34  ;;  %1987 = vpow2.f32 %v1050_v46  ;;  %v1283_v38 = vld [vmem:[#allocation4 + $0x18] sm:$0xff]  ;;  %v1068_v59 = vmul.f32 1.442695, %v1011_v62 }
 0x2cf   : > { %v1232_v26 = vpop.permute.xlu0 %1231  ;;  %v1056_v48 = vmul.f32 1.442695, %v1005_v42  ;;  %1989 = vpow2.f32 %v1052_v44 }
 0x2d0   : > { %vm1268_vm11 = vcmp.eq.s32.totalorder %v2868_v40, %v1232_v26  ;;  %vm1269_vm12 = vcmp.eq.s32.totalorder %v2872_v1, %v1232_v26  ;;  %1353 = vadd.xlane.f32.xlu0 %v1352_v2  ;;  %1991 = vpow2.f32 %v1054_v20  ;;  %v1062_v60 = vmul.f32 1.442695, %v1008_v50 }
 0x2d1   : > { %v1316_v28 = vsel %vm1268_vm11, %v2529_v54, 0.0  ;;  %v1317_v41 = vsel %vm1269_vm12, %v2533_v56, 0.0  ;;  %1993 = vpow2.f32 %v1056_v48  ;;  %v1010_v2 = vsub.f32 %v2557_v3, %v2936_v27 }
 0x2d2   : > { %v1358_v43 = vadd.f32 %v1317_v41, %v1316_v28  ;;  %v1064_v26 = vmul.f32 1.442695, %v1009_v53  ;;  %v1094_v28 = vadd.f32 %v1982_v36, %v1980_v47  ;;  %v1986_v41 = vpop.eup %1985 }
 0x2d3   : > { %v1238_v57 = vpop.permute.xlu0 %1237  ;;  %v1100_v32 = vadd.f32 %v1986_v41, %v1984_v4  ;;  %v3285_v4 = vld [vmem:[#allocation28_spill] sm:$0xff] }
 0x2d4   : > { %vm1272_vm13 = vcmp.eq.s32.totalorder %v2868_v40, %v1238_v57  ;;  %vm1273_vm14 = vcmp.eq.s32.totalorder %v2872_v1, %v1238_v57  ;;  %1359 = vadd.xlane.f32.xlu0 %v1358_v43  ;;  %v1066_v43 = vmul.f32 1.442695, %v1010_v2 }
 0x2d5   : > { %v1320_v54 = vsel %vm1272_vm13, %v2557_v3, 0.0  ;;  %v1321_v56 = vsel %vm1273_vm14, %v2561_v5, 0.0  ;;  %v1014_v3 = vsub.f32 %v2585_v31, %v2944_v12  ;;  %v1015_v5 = vsub.f32 %v2589_v33, %v2944_v12  ;;  %v1289_v12 = vld [vmem:[#allocation4 + $0x48] sm:$0xff] }
 0x2d6   : > { %v1364_v14 = vadd.f32 %v1321_v56, %v1320_v54 }
 0x2d7   : > { %v3005_v23 = vpop.permute.xlu0 %1243  ;;  %v1074_v25 = vmul.f32 1.442695, %v1014_v3  ;;  %v1076_v22 = vmul.f32 1.442695, %v1015_v5  ;;  %v3288_v3 = vld [vmem:[#allocation31_spill] sm:$0xff] }
 0x2d8   : > { %1365 = vadd.xlane.f32.xlu0 %v1364_v14  ;;  %v1988_v30 = vpop.eup %1987  ;;  %vm1276_vm2 = vcmp.eq.s32.totalorder %v2868_v40, %v3005_v23  ;;  %vm1277_vm3 = vcmp.eq.s32.totalorder %v2872_v1, %v3005_v23  ;;  %v3281_v40 = vsub.f32 %v2723_v29, %v2737_v45  ;;  %v3282_v1 = vsub.f32 %v2742_v51, %v2756_v0  ;;  %v874_v29 = vld [vmem:[#allocation3] sm:$0xff] }
 0x2d9   : > { %v1990_v54 = vpop.eup %1989 }
 0x2da   : > { %v1992_v56 = vpop.eup %1991  ;;  %v1106_v44 = vadd.f32 %v1990_v54, %v1988_v30  ;;  %v852_v23 = vmul.f32 1.442695, %v3282_v1 }
 0x2db   : > { %v984_v18 = vpop.permute.xlu0 %983  ;;  %v1994_v14 = vpop.eup %1993 }
 0x2dc   : > { %v1016_v7 = vsub.f32 %v2597_v37, %v984_v18  ;;  %v1017_v49 = vsub.f32 %v2601_v39, %v984_v18  ;;  %v1333_v52 = vpop.xlane.xlu1 %1332  ;;  %1086 = vadd.xlane.f32.xlu0 %v1085_v58  ;;  %v1326_v58 = vsel %vm1278_vm15, %v2597_v37, 0.0  ;;  %v1109_v47 = vadd.f32 %v1994_v14, %v1992_v56 }
 0x2dd   : > { %v1377_v24 = vadd.f32 %v1333_v52, %v1281_v9  ;;  %v1373_v19 = vadd.f32 %v1327_v35, %v1326_v58  ;;  %v1324_v39 = vsel %vm1276_vm2, %v2585_v31, 0.0  ;;  %v1291_v31 = vld [vmem:[#allocation4 + $0x58] sm:$0xff]  ;;  %v887_v58 = vld [vmem:[#allocation3 + $0x68] sm:$0xff] }
 0x2de   : > { %v1078_v55 = vmul.f32 1.442695, %v1016_v7  ;;  %v1080_v17 = vmul.f32 1.442695, %v1017_v49 }
 0x2df   : > { %1393 = vst.msk [vmem:[#allocation4 + $0x8] sm:$0xff] %vm1146_vm1, %v1377_v24 }
 0x2e0   : > { %1995 = vpow2.f32 %v1078_v55  ;;  %v1339_v15 = vpop.xlane.xlu1 %1338  ;;  %1089 = vadd.xlane.f32.xlu0 %v1088_v63  ;;  %v1325_v55 = vsel %vm1277_vm3, %v2589_v33, 0.0 }
 0x2e1   : > { %1997 = vpow2.f32 %v1080_v17  ;;  %v1379_v34 = vadd.f32 %v1339_v15, %v1283_v38  ;;  %v1370_v17 = vadd.f32 %v1325_v55, %v1324_v39  ;;  %v3280_v38 = vsub.f32 %v2715_v13, %v2721_v16  ;;  %v1293_v13 = vld [vmem:[#allocation4 + $0x68] sm:$0xff] }
 0x2e2   : > { %1999 = vpow2.f32 %v1062_v60  ;;  %v848_v60 = vmul.f32 1.442695, %v3281_v40  ;;  %v3283_v15 = vsub.f32 %v2761_v11, %v2775_v6  ;;  %v3287_v6 = vld [vmem:[#allocation29_spill] sm:$0xff] }
 0x2e3   : > { %1395 = vst.msk [vmem:[#allocation4 + $0x18] sm:$0xff] %vm1146_vm1, %v1379_v34  ;;  %2001 = vpow2.f32 %v1064_v26  ;;  %v842_v63 = vmul.f32 1.442695, %v3280_v38  ;;  %v3284_v34 = vld [vmem:[#allocation26_spill] sm:$0xff]  ;;  %v3296_v40 = vld [vmem:[#allocation17_spill] sm:$0xff] }
 0x2e4   : > { %v1345_v57 = vpop.xlane.xlu1 %1344  ;;  %1095 = vadd.xlane.f32.xlu0 %v1094_v28  ;;  %2003 = vpow2.f32 %v1066_v43  ;;  %v856_v26 = vmul.f32 1.442695, %v3283_v15  ;;  %v3286_v51 = vsub.f32 %v3284_v34, %v3285_v4  ;;  %v877_v43 = vld [vmem:[#allocation3 + $0x18] sm:$0xff]  ;;  %v3299_v15 = vld [vmem:[#allocation19_spill] sm:$0xff]  ;;  %v3303_v34 = vld [vmem:[#allocation33_spill] sm:$0xff] }
 0x2e5   : > { %v1381_v27 = vadd.f32 %v1345_v57, %v1285_v10  ;;  %2005 = vpow2.f32 %v1068_v59  ;;  %v3289_v57 = vsub.f32 %v3287_v6, %v3288_v3 }
 0x2e6   : > { %2007 = vpow2.f32 %v1074_v25  ;;  %v862_v0 = vmul.f32 1.442695, %v3286_v51 }
 0x2e7   : > { %1397 = vst.msk [vmem:[#allocation4 + $0x28] sm:$0xff] %vm1146_vm1, %v1381_v27  ;;  %2009 = vpow2.f32 %v1076_v22  ;;  %v868_v59 = vmul.f32 1.442695, %v3289_v57 }
 0x2e8   : > { %v1351_v8 = vpop.xlane.xlu1 %1350  ;;  %1101 = vadd.xlane.f32.xlu0 %v1100_v32  ;;  %2011 = vpow2.f32 %v842_v63 }
 0x2e9   : > { %v1383_v42 = vadd.f32 %v1351_v8, %v1287_v61  ;;  %2013 = vpow2.f32 %v848_v60  ;;  %v879_v61 = vld [vmem:[#allocation3 + $0x28] sm:$0xff]  ;;  %v881_v8 = vld [vmem:[#allocation3 + $0x38] sm:$0xff] }
 0x2ea   : > { %v1996_v46 = vpop.eup %1995  ;;  %2015 = vpow2.f32 %v852_v23  ;;  %v3297_v60 = vld [vmem:[#allocation18_spill] sm:$0xff] }
 0x2eb   : > { %v1998_v21 = vpop.eup %1997  ;;  %1399 = vst.msk [vmem:[#allocation4 + $0x38] sm:$0xff] %vm1146_vm1, %v1383_v42  ;;  %2017 = vpow2.f32 %v856_v26  ;;  %v3298_v1 = vsub.f32 %v3296_v40, %v3297_v60  ;;  %v3300_v26 = vld [vmem:[#allocation20_spill] sm:$0xff]  ;;  %v883_v60 = vld [vmem:[#allocation3 + $0x48] sm:$0xff] }
 0x2ec   : > { %v1357_v20 = vpop.xlane.xlu1 %1356  ;;  %1107 = vadd.xlane.f32.xlu0 %v1106_v44  ;;  %v1127_v9 = vadd.f32 %v1998_v21, %v1996_v46  ;;  %v2000_v18 = vpop.eup %1999  ;;  %2019 = vpow2.f32 %v862_v0  ;;  %v875_v0 = vld [vmem:[#allocation3 + $0x8] sm:$0xff] }
 0x2ed   : > { %v1385_v48 = vadd.f32 %v1357_v20, %v1289_v12  ;;  %v2002_v50 = vpop.eup %2001  ;;  %2021 = vpow2.f32 %v868_v59  ;;  %v884_v12 = vld [vmem:[#allocation3 + $0x50] sm:$0xff]  ;;  %v850_v23 = vmul.f32 1.442695, %v3298_v1 }
 0x2ee   : > { %1128 = vadd.xlane.f32.xlu1 %v1127_v9  ;;  %v2004_v7 = vpop.eup %2003  ;;  %v1115_v49 = vadd.f32 %v2002_v50, %v2000_v18  ;;  %v3290_v50 = vld [vmem:[#allocation15_spill] sm:$0xff] }
 0x2ef   : > { %1401 = vst.msk [vmem:[#allocation4 + $0x48] sm:$0xff] %vm1146_vm1, %v1385_v48  ;;  %v2006_v52 = vpop.eup %2005 }
 0x2f0   : > { %1110 = vadd.xlane.f32.xlu0 %v1109_v47  ;;  %v2008_v36 = vpop.eup %2007  ;;  %v1118_v53 = vadd.f32 %v2006_v52, %v2004_v7  ;;  %v1286_v52 = vld [vmem:[#allocation4 + $0x30] sm:$0xff] }
 0x2f1   : > { %v2010_v24 = vpop.eup %2009 }
 0x2f2   : > { %1374 = vadd.xlane.f32.xlu1 %v1373_v19  ;;  %v1124_v37 = vadd.f32 %v2010_v24, %v2008_v36  ;;  %v2012_v16 = vpop.eup %2011  ;;  %v3291_v19 = vld [vmem:[#allocation16_spill] sm:$0xff]  ;;  %v3293_v24 = vld [vmem:[#allocation13_spill] sm:$0xff] }
 0x2f3   : > { %v890_v10 = vmul.f32 %v2012_v16, %v874_v29  ;;  %v2014_v28 = vpop.eup %2013  ;;  %v3292_v7 = vsub.f32 %v3290_v50, %v3291_v19 }
 0x2f4   : > { %1116 = vadd.xlane.f32.xlu0 %v1115_v49  ;;  %v893_v5 = vmul.f32 %v2014_v28, %v877_v43  ;;  %v2016_v27 = vpop.eup %2015  ;;  %v3304_v28 = vld [vmem:[#allocation22_spill] sm:$0xff] }
 0x2f5   : > { %v895_v54 = vmul.f32 %v2016_v27, %v879_v61  ;;  %v2018_v56 = vpop.eup %2017  ;;  %v844_v49 = vmul.f32 1.442695, %v3292_v7  ;;  %v3308_v61 = vld [vmem:[#allocation23_spill] sm:$0xff] }
 0x2f6   : > { %v897_v22 = vmul.f32 %v2018_v56, %v881_v8  ;;  %v2020_v42 = vpop.eup %2019 }
 0x2f7   : > { %v900_v21 = vmul.f32 %v2020_v42, %v884_v12  ;;  %v2022_v20 = vpop.eup %2021  ;;  %2023 = vpow2.f32 %v844_v49  ;;  %v3310_v42 = vld [vmem:[#allocation25_spill] sm:$0xff] }
 0x2f8   : > { %1119 = vadd.xlane.f32.xlu0 %v1118_v53  ;;  %v903_v48 = vmul.f32 %v2022_v20, %v887_v58  ;;  %v880_v58 = vld [vmem:[#allocation3 + $0x30] sm:$0xff] }
 0x2fc   : > { %1125 = vadd.xlane.f32.xlu0 %v1124_v37  ;;  %v3294_v37 = vld [vmem:[#allocation14_spill] sm:$0xff] }
 0x2fd   : > { %v3295_v39 = vsub.f32 %v3293_v24, %v3294_v37  ;;  %v3316_v24 = vld [vmem:[#allocation34_spill] sm:$0xff]  ;;  %v3317_v37 = vld [vmem:[#allocation36_spill] sm:$0xff] }
 0x2ff   : > { %v846_v55 = vmul.f32 1.442695, %v3295_v39  ;;  %v3318_v39 = vsub.f32 %v3316_v24, %v3317_v37  ;;  %v1415_v24 = vld [vmem:[#allocation2 + $0x18] sm:$0xff] (!%p1760_p2) }
 0x300   : > { %1371 = vadd.xlane.f32.xlu0 %v1370_v17  ;;  %v1288_v17 = vld [vmem:[#allocation4 + $0x40] sm:$0xff] }
 0x301   : > { %2025 = vpow2.f32 %v846_v55  ;;  %v2024_v29 = vpop.eup %2023  ;;  %v870_v55 = vmul.f32 1.442695, %v3318_v39 }
 0x302   : > { %2027 = vpow2.f32 %v850_v23  ;;  %v891_v6 = vmul.f32 %v2024_v29, %v875_v0  ;;  %v886_v0 = vld [vmem:[#allocation3 + $0x60] sm:$0xff] }
 0x30b   : > { %v2026_v3 = vpop.eup %2025 }
 0x334   : > { %v1363_v2 = vpop.xlane.xlu1 %1362 }
 0x335   : > { %v1387_v33 = vadd.f32 %v1363_v2, %v1291_v31  ;;  %v1290_v31 = vld [vmem:[#allocation4 + $0x50] sm:$0xff] }
 0x337   : > { %1403 = vst.msk [vmem:[#allocation4 + $0x58] sm:$0xff] %vm1146_vm1, %v1387_v33 }
 0x338   : > { %v1369_v62 = vpop.xlane.xlu1 %1368 }
 0x339   : > { %v1389_v45 = vadd.f32 %v1369_v62, %v1293_v13  ;;  %v3301_v13 = vsub.f32 %v3299_v15, %v3300_v26  ;;  %v1292_v62 = vld [vmem:[#allocation4 + $0x60] sm:$0xff] }
 0x33b   : > { %1405 = vst.msk [vmem:[#allocation4 + $0x68] sm:$0xff] %vm1146_vm1, %v1389_v45  ;;  %v854_v16 = vmul.f32 1.442695, %v3301_v13  ;;  %v3302_v45 = vld [vmem:[#allocation35_spill] sm:$0xff]  ;;  %v1295_v13 = vld [vmem:[#allocation4 + $0x78] sm:$0xff] }
 0x33c   : > { %v1084_v41 = vpop.xlane.xlu1 %1083  ;;  %v841_v4 = vsub.f32 %v3303_v34, %v3302_v45 }
 0x33d   : > { %v1130_v11 = vadd.f32 %v1084_v41, %v890_v10  ;;  %2029 = vpow2.f32 %v854_v16  ;;  %v3305_v41 = vld [vmem:[#allocation24_spill] sm:$0xff] }
 0x33e   : > { %v3306_v43 = vsub.f32 %v3304_v28, %v3305_v41  ;;  %v872_v57 = vmul.f32 1.442695, %v841_v4  ;;  %v885_v16 = vld [vmem:[#allocation3 + $0x58] sm:$0xff] }
 0x33f   : > { %1147 = vst.msk [vmem:[#allocation3] sm:$0xff] %vm1146_vm1, %v1130_v11 }
 0x340   : > { %v1093_v30 = vpop.xlane.xlu1 %1092  ;;  %v858_v11 = vmul.f32 1.442695, %v3306_v43 }
 0x341   : > { %v1133_v32 = vadd.f32 %v1093_v30, %v893_v5  ;;  %v876_v5 = vld [vmem:[#allocation3 + $0x10] sm:$0xff]  ;;  %v3307_v30 = vld [vmem:[#allocation21_spill] sm:$0xff] }
 0x342   : > { %2031 = vpow2.f32 %v858_v11  ;;  %v892_v56 = vmul.f32 %v2026_v3, %v876_v5  ;;  %v888_v11 = vld [vmem:[#allocation3 + $0x70] sm:$0xff] }
 0x343   : > { %1150 = vst.msk [vmem:[#allocation3 + $0x18] sm:$0xff] %vm1146_vm1, %v1133_v32  ;;  %v3309_v32 = vsub.f32 %v3307_v30, %v3308_v61  ;;  %2033 = vpow2.f32 %v872_v57  ;;  %v1294_v5 = vld [vmem:[#allocation4 + $0x70] sm:$0xff] }
 0x344   : > { %v1099_v25 = vpop.xlane.xlu1 %1098 }
 0x345   : > { %v1135_v14 = vadd.f32 %v1099_v25, %v895_v54  ;;  %v860_v54 = vmul.f32 1.442695, %v3309_v32  ;;  %v2028_v25 = vpop.eup %2027 }
 0x346   : > { %v1428_v61 = vld [vmem:[#allocation3] sm:$0xff] (!%p1760_p2) }
 0x347   : > { %1152 = vst.msk [vmem:[#allocation3 + $0x28] sm:$0xff] %vm1146_vm1, %v1135_v14  ;;  %v878_v14 = vld [vmem:[#allocation3 + $0x20] sm:$0xff]  ;;  %2035 = vpow2.f32 %v860_v54  ;;  %v2030_v20 = vpop.eup %2029 }
 0x348   : > { %v1105_v46 = vpop.xlane.xlu1 %1104  ;;  %v896_v19 = vmul.f32 %v2030_v20, %v880_v58 }
 0x349   : > { %v1137_v44 = vadd.f32 %v1105_v46, %v897_v22  ;;  %v3311_v46 = vld [vmem:[#allocation27_spill] sm:$0xff] }
 0x34a   : > { %v3312_v12 = vsub.f32 %v3310_v42, %v3311_v46 }
 0x34b   : > { %1154 = vst.msk [vmem:[#allocation3 + $0x38] sm:$0xff] %vm1146_vm1, %v1137_v44 }
 0x34c   : > { %v1114_v9 = vpop.xlane.xlu1 %1113  ;;  %v864_v44 = vmul.f32 1.442695, %v3312_v12  ;;  %v2032_v7 = vpop.eup %2031 }
 0x34d   : > { %v1140_v35 = vadd.f32 %v1114_v9, %v900_v21  ;;  %v894_v21 = vmul.f32 %v2028_v25, %v878_v14 }
 0x34e   : > { %2037 = vpow2.f32 %v864_v44 }
 0x34f   : > { %1157 = vst.msk [vmem:[#allocation3 + $0x50] sm:$0xff] %vm1146_vm1, %v1140_v35 }
 0x350   : > { %v1123_v18 = vpop.xlane.xlu1 %1122 }
 0x351   : > { %v1143_v47 = vadd.f32 %v1123_v18, %v903_v48  ;;  %v3313_v48 = vld [vmem:[#allocation30_spill] sm:$0xff]  ;;  %v3314_v18 = vld [vmem:[#allocation32_spill] sm:$0xff] }
 0x353   : > { %1160 = vst.msk [vmem:[#allocation3 + $0x68] sm:$0xff] %vm1146_vm1, %v1143_v47  ;;  %v3315_v47 = vsub.f32 %v3313_v48, %v3314_v18 }
 0x355   : > { %v866_v50 = vmul.f32 1.442695, %v3315_v47  ;;  %v1492_v47 = vld [vmem:[#allocation4] sm:$0xff] (!%p1760_p2) }
 0x356   : > { %v1438_v12 = vld [vmem:[#allocation3 + $0x50] sm:$0xff] (!%p1760_p2) }
 0x357   : > { %2039 = vpow2.f32 %v866_v50 }
 0x358   : > { %2041 = vpow2.f32 %v870_v55 }
 0x359   : > { %v1348_v36 = vpop.xlane.xlu0 %1347  ;;  %2043 = vlog2.f32 (!%p1760_p2), %v1428_v61  ;;  %v1421_v61 = vld [vmem:[#allocation2 + $0x48] sm:$0xff] (!%p1760_p2) }
 0x35a   : > { %v1382_v53 = vadd.f32 %v1348_v36, %v1286_v52  ;;  %v882_v52 = vld [vmem:[#allocation3 + $0x40] sm:$0xff] }
 0x35c   : > { %1398 = vst.msk [vmem:[#allocation4 + $0x30] sm:$0xff] %vm1146_vm1, %v1382_v53  ;;  %v2034_v53 = vpop.eup %2033 }
 0x35d   : > { %v1354_v38 = vpop.xlane.xlu0 %1353 }
 0x35e   : > { %v1384_v63 = vadd.f32 %v1354_v38, %v1288_v17  ;;  %v889_v17 = vld [vmem:[#allocation3 + $0x78] sm:$0xff]  ;;  %v898_v38 = vmul.f32 %v2032_v7, %v882_v52  ;;  %v1441_v7 = vld [vmem:[#allocation3 + $0x68] sm:$0xff] (!%p1760_p2) }
 0x35f   : > { %v905_v23 = vmul.f32 %v2034_v53, %v889_v17  ;;  %v1494_v17 = vld [vmem:[#allocation4 + $0x10] sm:$0xff] (!%p1760_p2) }
 0x360   : > { %1400 = vst.msk [vmem:[#allocation4 + $0x40] sm:$0xff] %vm1146_vm1, %v1384_v63  ;;  %v2036_v63 = vpop.eup %2035 }
 0x361   : > { %v1360_v2 = vpop.xlane.xlu0 %1359  ;;  %v2038_v15 = vpop.eup %2037 }
 0x362   : > { %v1386_v33 = vadd.f32 %v1360_v2, %v1290_v31  ;;  %v901_v34 = vmul.f32 %v2038_v15, %v885_v16  ;;  %v2040_v4 = vpop.eup %2039  ;;  %v1496_v16 = vld [vmem:[#allocation4 + $0x20] sm:$0xff] (!%p1760_p2) }
 0x363   : > { %v902_v28 = vmul.f32 %v2040_v4, %v886_v0  ;;  %v2042_v41 = vpop.eup %2041 }
 0x364   : > { %1402 = vst.msk [vmem:[#allocation4 + $0x50] sm:$0xff] %vm1146_vm1, %v1386_v33  ;;  %v899_v33 = vmul.f32 %v2036_v63, %v883_v60  ;;  %v904_v3 = vmul.f32 %v2042_v41, %v888_v11  ;;  %v2044_v44 = vpop.eup (!%p1760_p2), %2043  ;;  %v1416_v63 = vld [vmem:[#allocation2 + $0x20] sm:$0xff] (!%p1760_p2)  ;;  %v1498_v11 = vld [vmem:[#allocation4 + $0x30] sm:$0xff] (!%p1760_p2) }
 0x365   : > { %v1366_v51 = vpop.xlane.xlu0 %1365  ;;  %v1445_v58 = vmul.f32 (!%p1760_p2), 0.6931472, %v2044_v44 }
 0x366   : > { %v1388_v10 = vadd.f32 %v1366_v51, %v1292_v62 }
 0x368   : > { %1404 = vst.msk [vmem:[#allocation4 + $0x60] sm:$0xff] %vm1146_vm1, %v1388_v10 }
 0x369   : > { %v1087_v59 = vpop.xlane.xlu0 %1086 }
 0x36a   : > { %v1131_v27 = vadd.f32 %v1087_v59, %v891_v6 }
 0x36c   : > { %1148 = vst.msk [vmem:[#allocation3 + $0x8] sm:$0xff] %vm1146_vm1, %v1131_v27 }
 0x36d   : > { %v1090_v8 = vpop.xlane.xlu0 %1089 }
 0x36e   : > { %v1132_v22 = vadd.f32 %v1090_v8, %v892_v56  ;;  %v1431_v56 = vld [vmem:[#allocation3 + $0x18] sm:$0xff] (!%p1760_p2)  ;;  %v1433_v8 = vld [vmem:[#allocation3 + $0x28] sm:$0xff] (!%p1760_p2) }
 0x370   : > { %1149 = vst.msk [vmem:[#allocation3 + $0x10] sm:$0xff] %vm1146_vm1, %v1132_v22  ;;  %v1435_v22 = vld [vmem:[#allocation3 + $0x38] sm:$0xff] (!%p1760_p2) }
 0x371   : > { %v1096_v9 = vpop.xlane.xlu0 %1095 }
 0x372   : > { %v1134_v35 = vadd.f32 %v1096_v9, %v894_v21  ;;  %v1412_v21 = vld [vmem:[#allocation2] sm:$0xff] (!%p1760_p2) }
 0x373   : > { %v1429_v32 = vld [vmem:[#allocation3 + $0x8] sm:$0xff] (!%p1760_p2)  ;;  %v1476_v52 = vadd.f32 (!%p1760_p2), %v1445_v58, %v1412_v21  ;;  %v1423_v21 = vld [vmem:[#allocation2 + $0x58] sm:$0xff] (!%p1760_p2) }
 0x374   : > { %1151 = vst.msk [vmem:[#allocation3 + $0x20] sm:$0xff] %vm1146_vm1, %v1134_v35  ;;  %2045 = vlog2.f32 (!%p1760_p2), %v1429_v32  ;;  %v1413_v35 = vld [vmem:[#allocation2 + $0x8] sm:$0xff] (!%p1760_p2) }
 0x375   : > { %v1102_v49 = vpop.xlane.xlu0 %1101 }
 0x376   : > { %v1136_v36 = vadd.f32 %v1102_v49, %v896_v19  ;;  %v1414_v19 = vld [vmem:[#allocation2 + $0x10] sm:$0xff] (!%p1760_p2) }
 0x377   : > { %v1430_v54 = vld [vmem:[#allocation3 + $0x10] sm:$0xff] (!%p1760_p2) }
 0x378   : > { %1153 = vst.msk [vmem:[#allocation3 + $0x30] sm:$0xff] %vm1146_vm1, %v1136_v36  ;;  %2047 = vlog2.f32 (!%p1760_p2), %v1430_v54  ;;  %v1493_v36 = vld [vmem:[#allocation4 + $0x8] sm:$0xff] (!%p1760_p2) }
 0x379   : > { %v1108_v40 = vpop.xlane.xlu0 %1107  ;;  %2049 = vlog2.f32 (!%p1760_p2), %v1431_v56 }
 0x37a   : > { %v1138_v1 = vadd.f32 %v1108_v40, %v898_v38 }
 0x37b   : > { %v1129_v31 = vpop.xlane.xlu1 %1128  ;;  %v1432_v25 = vld [vmem:[#allocation3 + $0x20] sm:$0xff] (!%p1760_p2) }
 0x37c   : > { %1155 = vst.msk [vmem:[#allocation3 + $0x40] sm:$0xff] %vm1146_vm1, %v1138_v1  ;;  %v1145_v2 = vadd.f32 %v1129_v31, %v905_v23  ;;  %2051 = vlog2.f32 (!%p1760_p2), %v1432_v25  ;;  %v1508_v1 = vsub.f32 (!%p1760_p2), %v1476_v52, %v1492_v47  ;;  %v1495_v31 = vld [vmem:[#allocation4 + $0x18] sm:$0xff] (!%p1760_p2)  ;;  %v1500_v25 = vld [vmem:[#allocation4 + $0x40] sm:$0xff] (!%p1760_p2)  ;;  %v1425_v52 = vld [vmem:[#allocation2 + $0x68] sm:$0xff] (!%p1760_p2) }
 0x37d   : > { %v1111_v26 = vpop.xlane.xlu0 %1110  ;;  %2053 = vlog2.f32 (!%p1760_p2), %v1433_v8 }
 0x37e   : > { %1162 = vst.msk [vmem:[#allocation3 + $0x78] sm:$0xff] %vm1146_vm1, %v1145_v2  ;;  %v1139_v62 = vadd.f32 %v1111_v26, %v899_v33  ;;  %v2046_v9 = vpop.eup (!%p1760_p2), %2045  ;;  %v1417_v33 = vld [vmem:[#allocation2 + $0x28] sm:$0xff] (!%p1760_p2)  ;;  %1524 = vst.msk [vmem:[%s2423_s27] sm:$0xff] (!%p1760_p2), %vm1146_vm1, %v1508_v1  ;;  %v1427_v1 = vld [vmem:[#allocation2 + $0x78] sm:$0xff] (!%p1760_p2) }
 0x37f   : > { %v1375_v29 = vpop.xlane.xlu1 %1374  ;;  %v1434_v14 = vld [vmem:[#allocation3 + $0x30] sm:$0xff] (!%p1760_p2)  ;;  %v1447_v50 = vmul.f32 (!%p1760_p2), 0.6931472, %v2046_v9 }
 0x380   : > { %1156 = vst.msk [vmem:[#allocation3 + $0x48] sm:$0xff] %vm1146_vm1, %v1139_v62  ;;  %v1391_v45 = vadd.f32 %v1375_v29, %v1295_v13  ;;  %2055 = vlog2.f32 (!%p1760_p2), %v1434_v14  ;;  %v1418_v29 = vld [vmem:[#allocation2 + $0x30] sm:$0xff] (!%p1760_p2) }
 0x381   : > { %v1117_v51 = vpop.xlane.xlu0 %1116  ;;  %2057 = vlog2.f32 (!%p1760_p2), %v1435_v22  ;;  %v1477_v55 = vadd.f32 (!%p1760_p2), %v1447_v50, %v1413_v35  ;;  %v1422_v14 = vld [vmem:[#allocation2 + $0x50] sm:$0xff] (!%p1760_p2) }
 0x382   : > { %1407 = vst.msk [vmem:[#allocation4 + $0x78] sm:$0xff] %vm1146_vm1, %v1391_v45  ;;  %v1141_v10 = vadd.f32 %v1117_v51, %v901_v34  ;;  %v2048_v18 = vpop.eup (!%p1760_p2), %2047  ;;  %v1497_v51 = vld [vmem:[#allocation4 + $0x28] sm:$0xff] (!%p1760_p2)  ;;  %v1502_v35 = vld [vmem:[#allocation4 + $0x50] sm:$0xff] (!%p1760_p2) }
 0x383   : > { %v1436_v42 = vld [vmem:[#allocation3 + $0x40] sm:$0xff] (!%p1760_p2)  ;;  %v2050_v49 = vpop.eup (!%p1760_p2), %2049  ;;  %v1449_v53 = vmul.f32 (!%p1760_p2), 0.6931472, %v2048_v18  ;;  %v1509_v26 = vsub.f32 (!%p1760_p2), %v1477_v55, %v1493_v36  ;;  %v1426_v55 = vld [vmem:[#allocation2 + $0x70] sm:$0xff] (!%p1760_p2) }
 0x384   : > { %1158 = vst.msk [vmem:[#allocation3 + $0x58] sm:$0xff] %vm1146_vm1, %v1141_v10  ;;  %2059 = vlog2.f32 (!%p1760_p2), %v1436_v42  ;;  %v1451_v38 = vmul.f32 (!%p1760_p2), 0.6931472, %v2050_v49  ;;  %v1419_v10 = vld [vmem:[#allocation2 + $0x38] sm:$0xff] (!%p1760_p2)  ;;  %v1424_v18 = vld [vmem:[#allocation2 + $0x60] sm:$0xff] (!%p1760_p2) }
 0x385   : > { %v1120_v43 = vpop.xlane.xlu0 %1119  ;;  %v1443_v40 = vld [vmem:[#allocation3 + $0x78] sm:$0xff] (!%p1760_p2)  ;;  %v1478_v23 = vadd.f32 (!%p1760_p2), %v1449_v53, %v1414_v19  ;;  %1525 = vst.msk [vmem:[%s2423_s27 + $0x8] sm:$0xff] (!%p1760_p2), %vm1146_vm1, %v1509_v26 }
 0x386   : > { %v1142_v6 = vadd.f32 %v1120_v43, %v902_v28  ;;  %v2052_v39 = vpop.eup (!%p1760_p2), %2051  ;;  %v1479_v13 = vadd.f32 (!%p1760_p2), %v1451_v38, %v1415_v24 }
 0x387   : > { %v1437_v46 = vld [vmem:[#allocation3 + $0x48] sm:$0xff] (!%p1760_p2)  ;;  %v2054_v60 = vpop.eup (!%p1760_p2), %2053  ;;  %v1453_v2 = vmul.f32 (!%p1760_p2), 0.6931472, %v2052_v39  ;;  %v1510_v34 = vsub.f32 (!%p1760_p2), %v1478_v23, %v1494_v17 }
 0x388   : > { %1159 = vst.msk [vmem:[#allocation3 + $0x60] sm:$0xff] %vm1146_vm1, %v1142_v6  ;;  %2061 = vlog2.f32 (!%p1760_p2), %v1437_v46  ;;  %v1455_v62 = vmul.f32 (!%p1760_p2), 0.6931472, %v2054_v60  ;;  %v1511_v41 = vsub.f32 (!%p1760_p2), %v1479_v13, %v1495_v31 }
 0x389   : > { %v1126_v57 = vpop.xlane.xlu0 %1125  ;;  %2063 = vlog2.f32 (!%p1760_p2), %v1438_v12  ;;  %v1480_v4 = vadd.f32 (!%p1760_p2), %v1453_v2, %v1416_v63  ;;  %1526 = vst.msk [vmem:[%s2423_s27 + $0x10] sm:$0xff] (!%p1760_p2), %vm1146_vm1, %v1510_v34  ;;  %v1501_v12 = vld [vmem:[#allocation4 + $0x48] sm:$0xff] (!%p1760_p2)  ;;  %v1507_v13 = vld [vmem:[#allocation4 + $0x78] sm:$0xff] (!%p1760_p2) }
 0x38a   : > { %v1144_v59 = vadd.f32 %v1126_v57, %v904_v3  ;;  %1411 = sbr.rel (%p1760_p2) target bundleno = 935 (0x3a7), region = 44  ;;  %v2056_v15 = vpop.eup (!%p1760_p2), %2055  ;;  %v1481_v43 = vadd.f32 (!%p1760_p2), %v1455_v62, %v1417_v33  ;;  %v1420_v3 = vld [vmem:[#allocation2 + $0x40] sm:$0xff] (!%p1760_p2)  ;;  %1527 = vst.msk [vmem:[%s2423_s27 + $0x18] sm:$0xff] (!%p1760_p2), %vm1146_vm1, %v1511_v41 }
 0x38b   : > { %v1439_v20 = vld [vmem:[#allocation3 + $0x58] sm:$0xff] (!%p1760_p2)  ;;  %v2058_v45 = vpop.eup (!%p1760_p2), %2057  ;;  %v1457_v0 = vmul.f32 (!%p1760_p2), 0.6931472, %v2056_v15 }
 0x38c   : > { %1161 = vst.msk [vmem:[#allocation3 + $0x70] sm:$0xff] %vm1146_vm1, %v1144_v59  ;;  %2065 = vlog2.f32 (!%p1760_p2), %v1439_v20  ;;  %v1459_v6 = vmul.f32 (!%p1760_p2), 0.6931472, %v2058_v45  ;;  %v1512_v59 = vsub.f32 (!%p1760_p2), %v1480_v4, %v1496_v16  ;;  %v1513_v54 = vsub.f32 (!%p1760_p2), %v1481_v43, %v1497_v51 }
 0x38d   : > { %v1372_v27 = vpop.xlane.xlu0 %1371 }
 0x38e   : > { %v1390_v30 = vadd.f32 %v1372_v27, %v1294_v5  ;;  %v2060_v28 = vpop.eup (!%p1760_p2), %2059  ;;  %v1482_v5 = vadd.f32 (!%p1760_p2), %v1457_v0, %v1418_v29  ;;  %v1499_v27 = vld [vmem:[#allocation4 + $0x38] sm:$0xff] (!%p1760_p2)  ;;  %v1483_v56 = vadd.f32 (!%p1760_p2), %v1459_v6, %v1419_v10  ;;  %1528 = vst.msk [vmem:[%s2423_s27 + $0x20] sm:$0xff] (!%p1760_p2), %vm1146_vm1, %v1512_v59  ;;  %1529 = vst.msk [vmem:[%s2423_s27 + $0x28] sm:$0xff] (!%p1760_p2), %vm1146_vm1, %v1513_v54 }
 0x38f   : > { %v1440_v48 = vld [vmem:[#allocation3 + $0x60] sm:$0xff] (!%p1760_p2) }
 0x390   : > { %1406 = vst.msk [vmem:[#allocation4 + $0x70] sm:$0xff] %vm1146_vm1, %v1390_v30  ;;  %2067 = vlog2.f32 (!%p1760_p2), %v1440_v48  ;;  %v1461_v30 = vmul.f32 (!%p1760_p2), 0.6931472, %v2060_v28  ;;  %v1514_v42 = vsub.f32 (!%p1760_p2), %v1482_v5, %v1498_v11  ;;  %v1515_v9 = vsub.f32 (!%p1760_p2), %v1483_v56, %v1499_v27 }
 0x391   : > { %2069 = vlog2.f32 %v1441_v7  ;;  %v1503_v7 = vld [vmem:[#allocation4 + $0x58] sm:$0xff] }
 0x392   : > { %v2062_v57 = vpop.eup %2061  ;;  %v1484_v46 = vadd.f32 %v1461_v30, %v1420_v3  ;;  %1530 = vst.msk [vmem:[%s2423_s27 + $0x30] sm:$0xff] %vm1146_vm1, %v1514_v42  ;;  %1531 = vst.msk [vmem:[%s2423_s27 + $0x38] sm:$0xff] %vm1146_vm1, %v1515_v9 }
 0x393   : > { %v1442_v37 = vld [vmem:[#allocation3 + $0x70] sm:$0xff]  ;;  %v2064_v32 = vpop.eup %2063  ;;  %v1463_v8 = vmul.f32 0.6931472, %v2062_v57 }
 0x394   : > { %2071 = vlog2.f32 %v1442_v37  ;;  %v1465_v44 = vmul.f32 0.6931472, %v2064_v32  ;;  %v1516_v50 = vsub.f32 %v1484_v46, %v1500_v25  ;;  %v1504_v37 = vld [vmem:[#allocation4 + $0x60] sm:$0xff] }
 0x395   : > { %2073 = vlog2.f32 %v1443_v40  ;;  %v1485_v58 = vadd.f32 %v1463_v8, %v1421_v61  ;;  %v1505_v40 = vld [vmem:[#allocation4 + $0x68] sm:$0xff] }
 0x396   : > { %v2066_v22 = vpop.eup %2065  ;;  %v1486_v19 = vadd.f32 %v1465_v44, %v1422_v14  ;;  %1532 = vst.msk [vmem:[%s2423_s27 + $0x40] sm:$0xff] %vm1146_vm1, %v1516_v50 }
 0x397   : > { %v1467_v48 = vmul.f32 0.6931472, %v2066_v22  ;;  %v1517_v53 = vsub.f32 %v1485_v58, %v1501_v12  ;;  %v1506_v2 = vld [vmem:[#allocation4 + $0x70] sm:$0xff] }
 0x398   : > { %v1518_v38 = vsub.f32 %v1486_v19, %v1502_v35 }
 0x399   : > { %v1487_v24 = vadd.f32 %v1467_v48, %v1423_v21  ;;  %1533 = vst.msk [vmem:[%s2423_s27 + $0x48] sm:$0xff] %vm1146_vm1, %v1517_v53 }
 0x39a   : > { %v2068_v20 = vpop.eup %2067  ;;  %1534 = vst.msk [vmem:[%s2423_s27 + $0x50] sm:$0xff] %vm1146_vm1, %v1518_v38 }
 0x39b   : > { %v2070_v47 = vpop.eup %2069  ;;  %v1469_v49 = vmul.f32 0.6931472, %v2068_v20  ;;  %v1519_v23 = vsub.f32 %v1487_v24, %v1503_v7 }
 0x39c   : > { %v1471_v39 = vmul.f32 0.6931472, %v2070_v47 }
 0x39d   : > { %v1488_v63 = vadd.f32 %v1469_v49, %v1424_v18  ;;  %1535 = vst.msk [vmem:[%s2423_s27 + $0x58] sm:$0xff] %vm1146_vm1, %v1519_v23 }
 0x39e   : > { %v2072_v36 = vpop.eup %2071  ;;  %v1489_v31 = vadd.f32 %v1471_v39, %v1425_v52 }
 0x39f   : > { %v2074_v17 = vpop.eup %2073  ;;  %v1473_v60 = vmul.f32 0.6931472, %v2072_v36  ;;  %v1520_v15 = vsub.f32 %v1488_v63, %v1504_v37 }
 0x3a0   : > { %v1475_v33 = vmul.f32 0.6931472, %v2074_v17  ;;  %v1521_v16 = vsub.f32 %v1489_v31, %v1505_v40 }
 0x3a1   : > { %v1490_v26 = vadd.f32 %v1473_v60, %v1426_v55  ;;  %1536 = vst.msk [vmem:[%s2423_s27 + $0x60] sm:$0xff] %vm1146_vm1, %v1520_v15 }
 0x3a2   : > { %v1491_v62 = vadd.f32 %v1475_v33, %v1427_v1  ;;  %1537 = vst.msk [vmem:[%s2423_s27 + $0x68] sm:$0xff] %vm1146_vm1, %v1521_v16 }
 0x3a3   : > { %v1522_v29 = vsub.f32 %v1490_v26, %v1506_v2 }
 0x3a4   : > { %v1523_v45 = vsub.f32 %v1491_v62, %v1507_v13 }
 0x3a5   : > { %1538 = vst.msk [vmem:[%s2423_s27 + $0x70] sm:$0xff] %vm1146_vm1, %v1522_v29 }
 0x3a6   : > { %1539 = vst.msk [vmem:[%s2423_s27 + $0x78] sm:$0xff] %vm1146_vm1, %v1523_v45 }
 0x3a7 PF: > { %s1763_s9 = sshll.u32 %s2211_s21, 1  ;;  %s1785_s6 = sshll.u32 %s2215_s22, 7 }
 0x3a8   : > { %s1562_s11 = sshll.u32 %s2517_s29, 4  ;;  %s1559_s18 = sadd.s32 %s1785_s6, %s1763_s9  ;;  %s3147_s11 = int_to_ptr.vmem [resolvable:$true] %s1562_s11 }
 0x3a9   : > { %s1765_s30 = sshll.u32 %s1559_s18, 6  ;;  %s3156_s28 = scalar_lea.sflag [#allocation7], %s260_s10 }
 0x3aa   : > { %s3152_s27 = scalar_lea.hbm %s3220_s3, %s1765_s30  ;;  %s2105_s8 = scalar_lea.vmem %s3147_s11, 2048 }
 0x3ab   : > { %p2106_p4 = scmp.ne.s32.totalorder %s3147_s11, %s2105_s8  ;;  %p3319_p0 = scmp.ne.s32.totalorder %s3253_s13, 0 }
 0x3ac   : > { %s2236_s21 = smov [#allocation8]  }
 0x3ad   : > { %p2107_p1 = pnand %p2106_p4, %p3319_p0  ;;  %s2109_s22 = sshll.u32 %s2236_s21, 4  ;;  %s2110_s22 = int_to_ptr.vmem [resolvable:$false] %s2109_s22 }
 0x3ae   : > { %s2111_s29 = scalar_lea.vmem %s2110_s22, 4096  ;;  %p2112_p7 = scmp.lt.s32.totalorder %s3147_s11, %s2110_s22 }
 0x3af   : > { %p2108_p5 = pneg %p2107_p1  ;;  %p2113_p3 = scmp.lt.s32.totalorder %s2111_s29, %s2105_s8 }
 0x3b1   : > { %p2114_p10 = por %p2113_p3, %p2112_p7 }
 0x3b3   : > { %p2115_p11 = pnand %p2114_p10, %p2108_p5 }
 0x3b5   : > { %2118 = shalt.err (!%p2115_p11)
}
 0x3b6   : > { %s2119_s10 = scalar_lea.hbm %s3152_s27, 2048  ;;  %s2123_s18 = scalar_lea.hbm %s3220_s3, 16384 }
 0x3b7   : > { %p2120_p6 = scmp.ne.s32.totalorder %s3152_s27, %s2119_s10  ;;  %p2124_p13 = scmp.lt.u32.totalorder %s3152_s27, %s3220_s3 }
 0x3b8   : > { %p2125_p8 = scmp.lt.u32.totalorder %s2123_s18, %s2119_s10  ;;  %p2127_p4 = scmp.lt.u32.totalorder %s2119_s10, %s3152_s27 }
 0x3b9   : > { %p2121_p9 = pnand %p2120_p6, %p3319_p0 }
 0x3ba   : > { %p2126_p2 = por %p2125_p8, %p2124_p13 }
 0x3bb   : > { %p2122_p12 = pneg %p2121_p9 }
 0x3bc   : > { %p2128_p1 = por %p2127_p4, %p2126_p2 }
 0x3be   : > { %p2129_p5 = pnand %p2128_p1, %p2122_p12 }
 0x3c0   : > { %2132 = shalt.err (!%p2129_p5)
}
 0x3c1   : > { %s2237_s26 = smov 128   ;;  %s2238_s8 = smov 512  }
 0x3c2   : > { %s2239_s21 = smov 8  }
 0x3c3   : > { %1804 = dma.vmem_to_hbm [thread:$0]  (%p3319_p0), %s3147_s11, 2048, %s3152_s27, %s3156_s28, %s2237_s26, %s2238_s8, %s2239_s21  }
 0x3c4 PF: > { %p1815_p7 = scmp.ge.s32.totalorder %s2227_s25, 2  ;;  %s1581_s22 = sand.u32 1, %s2187_s15  }
 0x3c5   : > { %p3320_p3 = scmp.ne.s32.totalorder %s3254_s14, 0  ;;  %s1582_s29 = scalar_lea.sflag [#allocation7], %s1581_s22 }
 0x3c7   : > { %p1811_p10 = pnand %p1815_p7, %p3320_p3 }
 0x3c9   : > { %2182 = dma.done.wait (!%p1811_p10), %s1582_s29, 2048  }
 0x3ca   : > { %2184 = vsyncadd (!%p1811_p10), %s1582_s29, 4294965248  ;;  %s21_s25 = sadd.s32 1, %s2227_s25   ;;  %s3321_s13 = sld [smem:[#allocation11_spill]] }
 0x3cb   : > { %p18_p11 = scmp.ge.s32.totalorder %s21_s25, 10   ;;  %s3322_s11 = sld [smem:[#allocation12_spill]] }
 0x3cc   : > { %s3323_s15 = smov %s2191_s16  ;;  %s3324_s16 = smov %s2195_s17 }
 0x3cd   : > { %s3325_s17 = smov %s2353_s12  ;;  %s3326_s18 = smov %s2203_s19 }
 0x3ce   : > { %s3327_s19 = smov %s2207_s20  ;;  %s3328_s20 = smov %s2339_s7 }
 0x3cf   : > { %s3329_s21 = smov %s2219_s23  ;;  %s3330_s22 = smov %s2223_s24 }
 0x3d0   : > { %s3331_s23 = smov %s3321_s13  ;;  %20 = sbr.rel (!%p18_p11) target bundleno = 9 (0x9), region = 103 }
 0x3d1   : > { %s3332_s24 = smov %s3322_s11 }
 0x3d7   :  { %1595 = vsyncpa [#allocation6], 1 }
 0x3d8   :  { %1597 = vsyncpa [#allocation6 + $0x1], 1 }
 0x3d9   :  { %1598 = vsyncpa [#allocation7], 1 }
 0x3da   :  { %1600 = vsyncpa [#allocation7 + $0x1], 1 }

</bundles_post_ra>
